<compile_context>
chip_gen: v7x
topology: tpu7x:2x2x1
jax: 0.10.0
libtpu: 0.0.40
codegen_flags: <defaults>
</compile_context>

<pallas_src>
import functools

import jax
import jax.numpy as jnp
from jax import lax
from jax.experimental import pallas as pl
from jax.experimental.pallas import tpu as pltpu

THRESHOLD = 0.5
NEG_POS_RATIO = 3.0
ALPHA = 1.0
IMG_BLOCK = 32            # max images per grid step (rounded to sublane packing)
NUM_BISECT = 24           # top-k threshold bisection steps (error << f32 noise)
MAX_UNROLL_OBJECTS = 8    # Python-unroll the IoU loop up to this many objects


def _multibox_kernel(box_ref, locs_ref, scores_ref, prior_ref, out_ref, *,
                     n_objects, n_priors, n_classes, img_block):
    B, P, C, M = img_block, n_priors, n_classes, n_objects
    f32 = jnp.float32
    lane = lax.broadcasted_iota(jnp.int32, (1, P), 1)

    pf = prior_ref[...]                                    # (11, P) f32
    px0, py0, px1, py1 = pf[0:1], pf[1:2], pf[2:3], pf[3:4]
    parea = pf[4:5]
    pcx, pcy = pf[5:6], pf[6:7]
    ivw, ivh = pf[7:8], pf[8:9]                            # 10/pw, 10/ph
    lpw5, lph5 = pf[9:10], pf[10:11]                       # 5*log(pw), 5*log(ph)

    # per-object feature planes, each (B, M) f32
    b_x0, b_y0, b_x1, b_y1 = box_ref[0], box_ref[1], box_ref[2], box_ref[3]
    b_ar, b_cx, b_cy = box_ref[4], box_ref[5], box_ref[6]
    b_lw5, b_lh5, b_lab = box_ref[7], box_ref[8], box_ref[9]

    def _col(a, o):                                        # (B, 1) column o
        if isinstance(o, int):
            return a[:, o:o + 1]
        return lax.dynamic_slice_in_dim(a, o, 1, axis=1)

    # ---- IoU matching fused with the matched-feature gather -----------------
    # Forced assignment: each object's best prior gets iou 2.0 + o*1e-3 so it
    # clears the threshold and the LAST object assigned to a prior wins (torch
    # semantics).  NOTE: the o*1e-3 priority is strictly monotone in f32 for
    # M < ~2048 objects.
    def match_body(o, carry):
        best, gcx, gcy, glw5, glh5, glab = carry
        bx0, by0 = _col(b_x0, o), _col(b_y0, o)
        bx1, by1 = _col(b_x1, o), _col(b_y1, o)
        iw = jnp.maximum(jnp.minimum(px1, bx1) - jnp.maximum(px0, bx0), 0.0)
        ih = jnp.maximum(jnp.minimum(py1, by1) - jnp.maximum(py0, by0), 0.0)
        inter = iw * ih                                    # (B, P)
        iou = inter / (parea + _col(b_ar, o) - inter)      # exact: IoU==0.5 matters
        mx = jnp.max(iou, axis=1, keepdims=True)           # best prior per (img, obj)
        pidx = jnp.min(jnp.where(iou == mx, lane, P), axis=1, keepdims=True)
        iou = jnp.where(lane == pidx, 2.0 + o * 1e-3, iou)
        gt = iou > best
        best = jnp.where(gt, iou, best)
        gcx = jnp.where(gt, _col(b_cx, o), gcx)
        gcy = jnp.where(gt, _col(b_cy, o), gcy)
        glw5 = jnp.where(gt, _col(b_lw5, o), glw5)
        glh5 = jnp.where(gt, _col(b_lh5, o), glh5)
        glab = jnp.where(gt, _col(b_lab, o), glab)
        return best, gcx, gcy, glw5, glh5, glab

    zero = jnp.zeros((B, P), f32)
    carry = (jnp.full((B, P), -1.0, f32), zero, zero, zero, zero, zero)
    if M <= MAX_UNROLL_OBJECTS:
        for o in range(M):
            carry = match_body(o, carry)
    else:
        carry = lax.fori_loop(0, M, match_body, carry)
    best, gcx, gcy, glw5, glh5, glab = carry

    label = jnp.where(best < THRESHOLD, 0.0, glab)         # background = 0
    is_pos = label != 0.0
    n_pos = jnp.sum(jnp.where(is_pos, 1.0, 0.0), axis=1, keepdims=True)  # (B, 1)

    # ---- SSD gcxgcy encoding + L1 localization terms (positives only) -------
    t0 = (gcx - pcx) * ivw
    t1 = (gcy - pcy) * ivh
    t2 = glw5 - lpw5
    t3 = glh5 - lph5
    ld = (jnp.abs(locs_ref[0].astype(f32) - t0)
          + jnp.abs(locs_ref[1].astype(f32) - t1)
          + jnp.abs(locs_ref[2].astype(f32) - t2)
          + jnp.abs(locs_ref[3].astype(f32) - t3))
    loc_abs_sum = jnp.sum(jnp.where(is_pos, ld, 0.0), axis=1, keepdims=True)

    # ---- per-prior cross entropy: one class plane live at a time ------------
    m = scores_ref[0].astype(f32)
    for c in range(1, C):
        m = jnp.maximum(m, scores_ref[c].astype(f32))
    se = jnp.zeros((B, P), f32)
    s_at = jnp.zeros((B, P), f32)
    for c in range(C):
        s_c = scores_ref[c].astype(f32)                    # re-read: cheap vld
        se = se + jnp.exp(s_c - m)                         # exp rides the EUP slot
        s_at = jnp.where(label == float(c), s_c, s_at)
    ce = jnp.log(se) + m - s_at                            # (B, P)

    conf_pos_sum = jnp.sum(jnp.where(is_pos, ce, 0.0), axis=1, keepdims=True)
    conf_neg = jnp.where(is_pos, 0.0, ce)

    # ---- hard-negative mining: top-k sum via threshold bisection (k = 3*n_pos)
    # lo starts at 0 (conf_neg >= 0 up to ~1e-7 f32 rounding; such entries are
    # negligibly excluded from the top-k).
    k = jnp.minimum(NEG_POS_RATIO * n_pos, float(P))       # (B, 1)
    vmax = jnp.max(conf_neg, axis=1, keepdims=True)

    def _bisect(_, carry):
        lo, hi = carry
        mid = (lo + hi) * 0.5
        cnt = jnp.sum(jnp.where(conf_neg > mid, 1.0, 0.0), axis=1, keepdims=True)
        take_hi = cnt >= k                                 # k-th largest is > mid
        return jnp.where(take_hi, mid, lo), jnp.where(take_hi, hi, mid)

    _, hi = lax.fori_loop(0, NUM_BISECT, _bisect, (jnp.zeros_like(vmax), vmax))
    above = conf_neg > hi
    c_hi = jnp.sum(jnp.where(above, 1.0, 0.0), axis=1, keepdims=True)
    hard_neg_sum = (jnp.sum(jnp.where(above, conf_neg, 0.0), axis=1, keepdims=True)
                    + jnp.maximum(k - c_hi, 0.0) * hi)

    # ---- write per-image statistics (lane-dense 128-wide rows) --------------
    out_lane = lax.broadcasted_iota(jnp.int32, (1, 128), 1)
    out_ref[...] = (jnp.where(out_lane == 0, n_pos, 0.0)
                    + jnp.where(out_lane == 1, loc_abs_sum, 0.0)
                    + jnp.where(out_lane == 2, conf_pos_sum, 0.0)
                    + jnp.where(out_lane == 3, hard_neg_sum, 0.0))


def multibox_loss(pred_locs, pred_scores, boxes, labels, priors_cxcy, *,
                  img_block=IMG_BLOCK, ship_dtype=jnp.bfloat16):
    """MultiBoxLoss.forward: pred_locs (N,P,4), pred_scores (N,P,C),
    boxes (N,M,4) corner coords, labels (N,M) int, priors_cxcy (P,4)."""
    f32 = jnp.float32
    N, P, _ = pred_locs.shape
    C = pred_scores.shape[2]
    M = boxes.shape[1]

    # image-block granularity follows the shipped dtype's sublane packing
    item = jnp.dtype(ship_dtype).itemsize
    g = 16 if item == 2 else 8
    Ng = -(-N // g) * g
    B = max(g, (min(int(img_block), Ng) // g) * g)
    if Ng % B:
        B = g
    n_blocks = Ng // B
    N_pad = n_blocks * B
    pad = N_pad - N

    pred_locs = pred_locs.astype(ship_dtype)
    pred_scores = pred_scores.astype(ship_dtype)
    boxes = boxes.astype(f32)
    labels_f = labels.astype(f32)

    if pad:
        # padded images: valid dummy box, label 0 -> every contribution is 0
        pred_locs = jnp.concatenate(
            [pred_locs, jnp.zeros((pad, P, 4), ship_dtype)], axis=0)
        pred_scores = jnp.concatenate(
            [pred_scores, jnp.zeros((pad, P, C), ship_dtype)], axis=0)
        dummy = jnp.tile(jnp.asarray([0.0, 0.0, 1.0, 1.0], f32)[None, None, :],
                         (pad, M, 1))
        boxes = jnp.concatenate([boxes, dummy], axis=0)
        labels_f = jnp.concatenate([labels_f, jnp.zeros((pad, M), f32)], axis=0)

    # per-prior features (11, P)
    pcx, pcy, pw, ph = (priors_cxcy[:, j].astype(f32) for j in range(4))
    px0, py0 = pcx - pw / 2.0, pcy - ph / 2.0
    px1, py1 = pcx + pw / 2.0, pcy + ph / 2.0
    prior_feat = jnp.stack(
        [px0, py0, px1, py1, (px1 - px0) * (py1 - py0), pcx, pcy,
         10.0 / pw, 10.0 / ph, 5.0 * jnp.log(pw), 5.0 * jnp.log(ph)], axis=0)

    # per-object features (10, N_pad, M)
    bx0, by0, bx1, by1 = (boxes[..., j] for j in range(4))
    box_feat = jnp.stack(
        [bx0, by0, bx1, by1, (bx1 - bx0) * (by1 - by0),
         (bx0 + bx1) * 0.5, (by0 + by1) * 0.5,
         5.0 * jnp.log(bx1 - bx0), 5.0 * jnp.log(by1 - by0), labels_f], axis=0)

    # stays inside the same jit as the kernel (fuses with padding)
    locs_t = jnp.transpose(pred_locs, (2, 0, 1))       # (4, N_pad, P)
    scores_t = jnp.transpose(pred_scores, (2, 0, 1))   # (C, N_pad, P)

    kernel = functools.partial(_multibox_kernel, n_objects=M, n_priors=P,
                               n_classes=C, img_block=B)

    # explicit VMEM limit: v5e's default scoped VMEM is 16 MiB; cap at 48 MiB
    # so it remains safe on v7x (64 MiB physical per TensorCore).
    in_block_bytes = (10 * B * M * 4 + 16 * P * 4
                      + 4 * B * P * item + C * B * P * item)
    inter_bytes = 24 * B * P * 4
    est = 2 * in_block_bytes + 2 * B * 128 * 4 + inter_bytes + (2 << 20)
    vmem_limit = int(min(48 * 2**20, max(2 * est, 32 * 2**20)))

    stats = pl.pallas_call(
        kernel,
        out_shape=jax.ShapeDtypeStruct((N_pad, 128), jnp.float32),
        grid=(n_blocks,),
        in_specs=[
            pl.BlockSpec((10, B, M), lambda i: (0, i, 0)),   # box features
            pl.BlockSpec((4, B, P), lambda i: (0, i, 0)),    # predicted locs
            pl.BlockSpec((C, B, P), lambda i: (0, i, 0)),    # predicted scores
            pl.BlockSpec((11, P), lambda i: (0, 0)),         # prior features
        ],
        out_specs=pl.BlockSpec((B, 128), lambda i: (i, 0)),
        compiler_params=pltpu.CompilerParams(
            dimension_semantics=("parallel",),
            vmem_limit_bytes=vmem_limit),
    )(box_feat, locs_t, scores_t, prior_feat)

    n_pos_total = jnp.sum(stats[:, 0])
    # guard against all-background batches (torch would return NaN here)
    denom = jnp.maximum(n_pos_total, 1.0)
    loc_loss = jnp.sum(stats[:, 1]) / (4.0 * denom)          # nn.L1Loss() mean
    conf_loss = (jnp.sum(stats[:, 3]) + jnp.sum(stats[:, 2])) / denom
    return conf_loss + ALPHA * loc_loss


def reference_loss(pred_locs, pred_scores, boxes, labels, priors_cxcy):
    """Plain-JAX mirror of the torch forward (sort-based hard-negative mining)."""
    N, P, _ = pred_locs.shape
    M = boxes.shape[1]
    priors_xy = jnp.concatenate(
        [priors_cxcy[:, :2] - priors_cxcy[:, 2:] / 2.0,
         priors_cxcy[:, :2] + priors_cxcy[:, 2:] / 2.0], axis=1)
    true_locs, true_classes = [], []
    for i in range(N):
        b = boxes[i]
        ix0 = jnp.maximum(b[:, None, 0], priors_xy[None, :, 0])
        iy0 = jnp.maximum(b[:, None, 1], priors_xy[None, :, 1])
        ix1 = jnp.minimum(b[:, None, 2], priors_xy[None, :, 2])
        iy1 = jnp.minimum(b[:, None, 3], priors_xy[None, :, 3])
        inter = jnp.maximum(ix1 - ix0, 0.0) * jnp.maximum(iy1 - iy0, 0.0)
        area_b = ((b[:, 2] - b[:, 0]) * (b[:, 3] - b[:, 1]))[:, None]
        area_p = ((priors_xy[:, 2] - priors_xy[:, 0]) *
                  (priors_xy[:, 3] - priors_xy[:, 1]))[None, :]
        iou = inter / (area_b + area_p - inter)
        prior_for_obj = jnp.argmax(iou, axis=1)
        override = jnp.arange(P)[None, :] == prior_for_obj[:, None]
        iou = jnp.where(override,
                        2.0 + jnp.arange(M, dtype=jnp.float32)[:, None] * 1e-3, iou)
        best = jnp.max(iou, axis=0)
        obj_idx = jnp.argmax(iou, axis=0)
        lab = labels[i][obj_idx].astype(jnp.float32)
        lab = jnp.where(best < THRESHOLD, 0.0, lab)
        gb = b[obj_idx]
        cx = (gb[:, 0] + gb[:, 2]) / 2.0
        cy = (gb[:, 1] + gb[:, 3]) / 2.0
        w = gb[:, 2] - gb[:, 0]
        h = gb[:, 3] - gb[:, 1]
        t = jnp.stack([(cx - priors_cxcy[:, 0]) / (priors_cxcy[:, 2] / 10.0),
                       (cy - priors_cxcy[:, 1]) / (priors_cxcy[:, 3] / 10.0),
                       jnp.log(w / priors_cxcy[:, 2]) * 5.0,
                       jnp.log(h / priors_cxcy[:, 3]) * 5.0], axis=1)
        true_locs.append(t)
        true_classes.append(lab)
    true_locs = jnp.stack(true_locs)
    true_classes = jnp.stack(true_classes)
    pos = (true_classes != 0).astype(jnp.float32)
    n_pos = pos.sum(axis=1)
    loc_loss = (jnp.abs(pred_locs - true_locs).sum(-1) * pos).sum() / (4.0 * n_pos.sum())
    m = pred_scores.max(-1, keepdims=True)
    lse = jnp.log(jnp.exp(pred_scores - m).sum(-1)) + m[..., 0]
    s_at = jnp.take_along_axis(pred_scores, true_classes.astype(jnp.int32)[..., None],
                               axis=-1)[..., 0]
    ce = lse - s_at
    conf_pos = (ce * pos).sum()
    conf_neg = ce * (1.0 - pos)
    sorted_neg = jnp.sort(conf_neg, axis=1)[:, ::-1]
    hard = jnp.arange(P)[None, :] < (NEG_POS_RATIO * n_pos)[:, None]
    hard_sum = (sorted_neg * hard).sum()
    conf_loss = (hard_sum + conf_pos) / n_pos.sum()
    return conf_loss + ALPHA * loc_loss


if __name__ == "__main__":
    key = jax.random.PRNGKey(0)
    N, P, C, M = 2, 128, 8, 3          # batch, priors, classes, objects per image
    k1, k2, k3, k4, k5 = jax.random.split(key, 5)

    # prior boxes: 16x8 grid of centers, fixed 0.25 x 0.25 size (cxcy format)
    gx = (jnp.arange(16) + 0.5) / 16.0
    gy = (jnp.arange(8) + 0.5) / 8.0
    cxg, cyg = jnp.meshgrid(gx, gy, indexing="ij")
    priors_cxcy = jnp.stack([cxg.reshape(-1), cyg.reshape(-1),
                             jnp.full((P,), 0.25), jnp.full((P,), 0.25)],
                            axis=1).astype(jnp.float32)

    # ground-truth boxes (corner coords) and labels in 1..C-1
    centers = jax.random.uniform(k1, (N, M, 2), minval=0.25, maxval=0.75)
    sizes = jax.random.uniform(k2, (N, M, 2), minval=0.15, maxval=0.40)
    boxes = jnp.concatenate([centers - sizes / 2.0, centers + sizes / 2.0],
                            axis=-1).astype(jnp.float32)
    labels = jax.random.randint(k3, (N, M), 1, C)

    # predictions pre-rounded to bf16-representable values so the bf16-shipping
    # kernel and the f32 reference see bit-identical inputs
    pred_locs = jax.random.normal(k4, (N, P, 4), jnp.float32)
    pred_locs = pred_locs.astype(jnp.bfloat16).astype(jnp.float32)
    pred_scores = jax.random.normal(k5, (N, P, C), jnp.float32)
    pred_scores = pred_scores.astype(jnp.bfloat16).astype(jnp.float32)

    loss = jax.jit(multibox_loss)(pred_locs, pred_scores, boxes, labels,
                                  priors_cxcy)
    loss = jax.block_until_ready(loss)

    ref = reference_loss(pred_locs, pred_scores, boxes, labels, priors_cxcy)
    assert bool(jnp.isfinite(loss)), f"non-finite loss: {loss}"
    assert bool(jnp.allclose(loss, ref, rtol=2e-3, atol=2e-3)), (loss, ref)
    print("KERNEL_OK")
</pallas_src>

<mosaic_0001>
module attributes {stable_mosaic.version = 11 : i64} {
  func.func @_multibox_kernel(%arg0: i32, %arg1: memref<10x16x3xf32, #tpu.memory_space<vmem>>, %arg2: memref<4x16x128xbf16, #tpu.memory_space<vmem>>, %arg3: memref<8x16x128xbf16, #tpu.memory_space<vmem>>, %arg4: memref<11x128xf32, #tpu.memory_space<vmem>>, %arg5: memref<16x128xf32, #tpu.memory_space<vmem>>) attributes {dimension_semantics = [#tpu.dimension_semantics<parallel>], iteration_bounds = array<i64: 1>, scalar_prefetch = 0 : i64, scratch_operands = 0 : i64, tpu.core_type = #tpu.core_type<tc>, window_params = [{transform_indices = @transform_0, window_bounds = array<i64: 10, 16, 3>}, {transform_indices = @transform_1, window_bounds = array<i64: 4, 16, 128>}, {transform_indices = @transform_2, window_bounds = array<i64: 8, 16, 128>}, {pipeline_mode = #tpu.pipeline_mode<synchronous>, transform_indices = @transform_3, window_bounds = array<i64: 11, 128>}, {transform_indices = @transform_4, window_bounds = array<i64: 16, 128>}]} {
    %0 = tpu.iota {dimensions = array<i32: 1>} : vector<1x128xi32>
    %c0 = arith.constant 0 : index
    %c0_0 = arith.constant 0 : index
    %1 = vector.load %arg4[%c0, %c0_0] : memref<11x128xf32, #tpu.memory_space<vmem>>, vector<11x128xf32>
    %2 = vector.extract_strided_slice %1 {offsets = [0, 0], sizes = [1, 128], strides = [1, 1]} : vector<11x128xf32> to vector<1x128xf32>
    %3 = vector.extract_strided_slice %1 {offsets = [1, 0], sizes = [1, 128], strides = [1, 1]} : vector<11x128xf32> to vector<1x128xf32>
    %4 = vector.extract_strided_slice %1 {offsets = [2, 0], sizes = [1, 128], strides = [1, 1]} : vector<11x128xf32> to vector<1x128xf32>
    %5 = vector.extract_strided_slice %1 {offsets = [3, 0], sizes = [1, 128], strides = [1, 1]} : vector<11x128xf32> to vector<1x128xf32>
    %6 = vector.extract_strided_slice %1 {offsets = [4, 0], sizes = [1, 128], strides = [1, 1]} : vector<11x128xf32> to vector<1x128xf32>
    %7 = vector.extract_strided_slice %1 {offsets = [5, 0], sizes = [1, 128], strides = [1, 1]} : vector<11x128xf32> to vector<1x128xf32>
    %8 = vector.extract_strided_slice %1 {offsets = [6, 0], sizes = [1, 128], strides = [1, 1]} : vector<11x128xf32> to vector<1x128xf32>
    %9 = vector.extract_strided_slice %1 {offsets = [7, 0], sizes = [1, 128], strides = [1, 1]} : vector<11x128xf32> to vector<1x128xf32>
    %10 = vector.extract_strided_slice %1 {offsets = [8, 0], sizes = [1, 128], strides = [1, 1]} : vector<11x128xf32> to vector<1x128xf32>
    %11 = vector.extract_strided_slice %1 {offsets = [9, 0], sizes = [1, 128], strides = [1, 1]} : vector<11x128xf32> to vector<1x128xf32>
    %12 = vector.extract_strided_slice %1 {offsets = [10, 0], sizes = [1, 128], strides = [1, 1]} : vector<11x128xf32> to vector<1x128xf32>
    %c0_1 = arith.constant 0 : index
    %c0_2 = arith.constant 0 : index
    %c0_3 = arith.constant 0 : index
    %13 = vector.load %arg1[%c0_1, %c0_2, %c0_3] : memref<10x16x3xf32, #tpu.memory_space<vmem>>, vector<1x16x3xf32>
    %14 = vector.shape_cast %13 : vector<1x16x3xf32> to vector<16x3xf32>
    %c1 = arith.constant 1 : index
    %c0_4 = arith.constant 0 : index
    %c0_5 = arith.constant 0 : index
    %15 = vector.load %arg1[%c1, %c0_4, %c0_5] : memref<10x16x3xf32, #tpu.memory_space<vmem>>, vector<1x16x3xf32>
    %16 = vector.shape_cast %15 : vector<1x16x3xf32> to vector<16x3xf32>
    %c2 = arith.constant 2 : index
    %c0_6 = arith.constant 0 : index
    %c0_7 = arith.constant 0 : index
    %17 = vector.load %arg1[%c2, %c0_6, %c0_7] : memref<10x16x3xf32, #tpu.memory_space<vmem>>, vector<1x16x3xf32>
    %18 = vector.shape_cast %17 : vector<1x16x3xf32> to vector<16x3xf32>
    %c3 = arith.constant 3 : index
    %c0_8 = arith.constant 0 : index
    %c0_9 = arith.constant 0 : index
    %19 = vector.load %arg1[%c3, %c0_8, %c0_9] : memref<10x16x3xf32, #tpu.memory_space<vmem>>, vector<1x16x3xf32>
    %20 = vector.shape_cast %19 : vector<1x16x3xf32> to vector<16x3xf32>
    %c4 = arith.constant 4 : index
    %c0_10 = arith.constant 0 : index
    %c0_11 = arith.constant 0 : index
    %21 = vector.load %arg1[%c4, %c0_10, %c0_11] : memref<10x16x3xf32, #tpu.memory_space<vmem>>, vector<1x16x3xf32>
    %22 = vector.shape_cast %21 : vector<1x16x3xf32> to vector<16x3xf32>
    %c5 = arith.constant 5 : index
    %c0_12 = arith.constant 0 : index
    %c0_13 = arith.constant 0 : index
    %23 = vector.load %arg1[%c5, %c0_12, %c0_13] : memref<10x16x3xf32, #tpu.memory_space<vmem>>, vector<1x16x3xf32>
    %24 = vector.shape_cast %23 : vector<1x16x3xf32> to vector<16x3xf32>
    %c6 = arith.constant 6 : index
    %c0_14 = arith.constant 0 : index
    %c0_15 = arith.constant 0 : index
    %25 = vector.load %arg1[%c6, %c0_14, %c0_15] : memref<10x16x3xf32, #tpu.memory_space<vmem>>, vector<1x16x3xf32>
    %26 = vector.shape_cast %25 : vector<1x16x3xf32> to vector<16x3xf32>
    %c7 = arith.constant 7 : index
    %c0_16 = arith.constant 0 : index
    %c0_17 = arith.constant 0 : index
    %27 = vector.load %arg1[%c7, %c0_16, %c0_17] : memref<10x16x3xf32, #tpu.memory_space<vmem>>, vector<1x16x3xf32>
    %28 = vector.shape_cast %27 : vector<1x16x3xf32> to vector<16x3xf32>
    %c8 = arith.constant 8 : index
    %c0_18 = arith.constant 0 : index
    %c0_19 = arith.constant 0 : index
    %29 = vector.load %arg1[%c8, %c0_18, %c0_19] : memref<10x16x3xf32, #tpu.memory_space<vmem>>, vector<1x16x3xf32>
    %30 = vector.shape_cast %29 : vector<1x16x3xf32> to vector<16x3xf32>
    %c9 = arith.constant 9 : index
    %c0_20 = arith.constant 0 : index
    %c0_21 = arith.constant 0 : index
    %31 = vector.load %arg1[%c9, %c0_20, %c0_21] : memref<10x16x3xf32, #tpu.memory_space<vmem>>, vector<1x16x3xf32>
    %32 = vector.shape_cast %31 : vector<1x16x3xf32> to vector<16x3xf32>
    %cst = arith.constant 0.000000e+00 : f32
    %33 = vector.broadcast %cst : f32 to vector<16x128xf32>
    %cst_22 = arith.constant -1.000000e+00 : f32
    %34 = vector.broadcast %cst_22 : f32 to vector<16x128xf32>
    %35 = vector.extract_strided_slice %14 {offsets = [0, 0], sizes = [16, 1], strides = [1, 1]} : vector<16x3xf32> to vector<16x1xf32>
    %36 = vector.extract_strided_slice %16 {offsets = [0, 0], sizes = [16, 1], strides = [1, 1]} : vector<16x3xf32> to vector<16x1xf32>
    %37 = vector.extract_strided_slice %18 {offsets = [0, 0], sizes = [16, 1], strides = [1, 1]} : vector<16x3xf32> to vector<16x1xf32>
    %38 = vector.extract_strided_slice %20 {offsets = [0, 0], sizes = [16, 1], strides = [1, 1]} : vector<16x3xf32> to vector<16x1xf32>
    %39 = vector.broadcast %4 : vector<1x128xf32> to vector<16x128xf32>
    %40 = vector.broadcast %37 : vector<16x1xf32> to vector<16x128xf32>
    %41 = arith.minimumf %39, %40 : vector<16x128xf32>
    %42 = vector.broadcast %2 : vector<1x128xf32> to vector<16x128xf32>
    %43 = vector.broadcast %35 : vector<16x1xf32> to vector<16x128xf32>
    %44 = arith.maximumf %42, %43 : vector<16x128xf32>
    %45 = arith.subf %41, %44 : vector<16x128xf32>
    %cst_23 = arith.constant 0.000000e+00 : f32
    %46 = vector.broadcast %cst_23 : f32 to vector<16x128xf32>
    %47 = arith.maximumf %45, %46 : vector<16x128xf32>
    %48 = vector.broadcast %5 : vector<1x128xf32> to vector<16x128xf32>
    %49 = vector.broadcast %38 : vector<16x1xf32> to vector<16x128xf32>
    %50 = arith.minimumf %48, %49 : vector<16x128xf32>
    %51 = vector.broadcast %3 : vector<1x128xf32> to vector<16x128xf32>
    %52 = vector.broadcast %36 : vector<16x1xf32> to vector<16x128xf32>
    %53 = arith.maximumf %51, %52 : vector<16x128xf32>
    %54 = arith.subf %50, %53 : vector<16x128xf32>
    %cst_24 = arith.constant 0.000000e+00 : f32
    %55 = vector.broadcast %cst_24 : f32 to vector<16x128xf32>
    %56 = arith.maximumf %54, %55 : vector<16x128xf32>
    %57 = arith.mulf %47, %56 : vector<16x128xf32>
    %58 = vector.extract_strided_slice %22 {offsets = [0, 0], sizes = [16, 1], strides = [1, 1]} : vector<16x3xf32> to vector<16x1xf32>
    %59 = vector.broadcast %6 : vector<1x128xf32> to vector<16x128xf32>
    %60 = vector.broadcast %58 : vector<16x1xf32> to vector<16x128xf32>
    %61 = arith.addf %59, %60 : vector<16x128xf32>
    %62 = arith.subf %61, %57 : vector<16x128xf32>
    %63 = arith.divf %57, %62 : vector<16x128xf32>
    %cst_25 = arith.constant dense<0xFF800000> : vector<16xf32>
    %64 = vector.multi_reduction <maximumf>, %63, %cst_25 [1] : vector<16x128xf32> to vector<16xf32>
    %65 = vector.shape_cast %64 : vector<16xf32> to vector<16x1xf32>
    %66 = vector.broadcast %65 : vector<16x1xf32> to vector<16x128xf32>
    %67 = arith.cmpf oeq, %63, %66 : vector<16x128xf32>
    %c128_i32 = arith.constant 128 : i32
    %68 = vector.shape_cast %0 : vector<1x128xi32> to vector<1x128xi32>
    %69 = vector.broadcast %68 : vector<1x128xi32> to vector<16x128xi32>
    %70 = vector.broadcast %c128_i32 : i32 to vector<16x128xi32>
    %71 = arith.select %67, %69, %70 : vector<16x128xi1>, vector<16x128xi32>
    %cst_26 = arith.constant dense<2147483647> : vector<16xi32>
    %72 = vector.multi_reduction <minsi>, %71, %cst_26 [1] : vector<16x128xi32> to vector<16xi32>
    %73 = vector.shape_cast %72 : vector<16xi32> to vector<16x1xi32>
    %74 = vector.broadcast %0 : vector<1x128xi32> to vector<16x128xi32>
    %75 = vector.broadcast %73 : vector<16x1xi32> to vector<16x128xi32>
    %76 = arith.cmpi eq, %74, %75 : vector<16x128xi32>
    %cst_27 = arith.constant 2.000000e+00 : f32
    %77 = vector.broadcast %cst_27 : f32 to vector<16x128xf32>
    %78 = arith.select %76, %77, %63 : vector<16x128xi1>, vector<16x128xf32>
    %79 = arith.cmpf ogt, %78, %34 : vector<16x128xf32>
    %80 = arith.select %79, %78, %34 : vector<16x128xi1>, vector<16x128xf32>
    %81 = vector.extract_strided_slice %24 {offsets = [0, 0], sizes = [16, 1], strides = [1, 1]} : vector<16x3xf32> to vector<16x1xf32>
    %82 = vector.shape_cast %81 : vector<16x1xf32> to vector<16x1xf32>
    %83 = vector.broadcast %82 : vector<16x1xf32> to vector<16x128xf32>
    %84 = arith.select %79, %83, %33 : vector<16x128xi1>, vector<16x128xf32>
    %85 = vector.extract_strided_slice %26 {offsets = [0, 0], sizes = [16, 1], strides = [1, 1]} : vector<16x3xf32> to vector<16x1xf32>
    %86 = vector.shape_cast %85 : vector<16x1xf32> to vector<16x1xf32>
    %87 = vector.broadcast %86 : vector<16x1xf32> to vector<16x128xf32>
    %88 = arith.select %79, %87, %33 : vector<16x128xi1>, vector<16x128xf32>
    %89 = vector.extract_strided_slice %28 {offsets = [0, 0], sizes = [16, 1], strides = [1, 1]} : vector<16x3xf32> to vector<16x1xf32>
    %90 = vector.shape_cast %89 : vector<16x1xf32> to vector<16x1xf32>
    %91 = vector.broadcast %90 : vector<16x1xf32> to vector<16x128xf32>
    %92 = arith.select %79, %91, %33 : vector<16x128xi1>, vector<16x128xf32>
    %93 = vector.extract_strided_slice %30 {offsets = [0, 0], sizes = [16, 1], strides = [1, 1]} : vector<16x3xf32> to vector<16x1xf32>
    %94 = vector.shape_cast %93 : vector<16x1xf32> to vector<16x1xf32>
    %95 = vector.broadcast %94 : vector<16x1xf32> to vector<16x128xf32>
    %96 = arith.select %79, %95, %33 : vector<16x128xi1>, vector<16x128xf32>
    %97 = vector.extract_strided_slice %32 {offsets = [0, 0], sizes = [16, 1], strides = [1, 1]} : vector<16x3xf32> to vector<16x1xf32>
    %98 = vector.shape_cast %97 : vector<16x1xf32> to vector<16x1xf32>
    %99 = vector.broadcast %98 : vector<16x1xf32> to vector<16x128xf32>
    %100 = arith.select %79, %99, %33 : vector<16x128xi1>, vector<16x128xf32>
    %101 = vector.extract_strided_slice %14 {offsets = [0, 1], sizes = [16, 1], strides = [1, 1]} : vector<16x3xf32> to vector<16x1xf32>
    %102 = vector.extract_strided_slice %16 {offsets = [0, 1], sizes = [16, 1], strides = [1, 1]} : vector<16x3xf32> to vector<16x1xf32>
    %103 = vector.extract_strided_slice %18 {offsets = [0, 1], sizes = [16, 1], strides = [1, 1]} : vector<16x3xf32> to vector<16x1xf32>
    %104 = vector.extract_strided_slice %20 {offsets = [0, 1], sizes = [16, 1], strides = [1, 1]} : vector<16x3xf32> to vector<16x1xf32>
    %105 = vector.broadcast %4 : vector<1x128xf32> to vector<16x128xf32>
    %106 = vector.broadcast %103 : vector<16x1xf32> to vector<16x128xf32>
    %107 = arith.minimumf %105, %106 : vector<16x128xf32>
    %108 = vector.broadcast %2 : vector<1x128xf32> to vector<16x128xf32>
    %109 = vector.broadcast %101 : vector<16x1xf32> to vector<16x128xf32>
    %110 = arith.maximumf %108, %109 : vector<16x128xf32>
    %111 = arith.subf %107, %110 : vector<16x128xf32>
    %cst_28 = arith.constant 0.000000e+00 : f32
    %112 = vector.broadcast %cst_28 : f32 to vector<16x128xf32>
    %113 = arith.maximumf %111, %112 : vector<16x128xf32>
    %114 = vector.broadcast %5 : vector<1x128xf32> to vector<16x128xf32>
    %115 = vector.broadcast %104 : vector<16x1xf32> to vector<16x128xf32>
    %116 = arith.minimumf %114, %115 : vector<16x128xf32>
    %117 = vector.broadcast %3 : vector<1x128xf32> to vector<16x128xf32>
    %118 = vector.broadcast %102 : vector<16x1xf32> to vector<16x128xf32>
    %119 = arith.maximumf %117, %118 : vector<16x128xf32>
    %120 = arith.subf %116, %119 : vector<16x128xf32>
    %cst_29 = arith.constant 0.000000e+00 : f32
    %121 = vector.broadcast %cst_29 : f32 to vector<16x128xf32>
    %122 = arith.maximumf %120, %121 : vector<16x128xf32>
    %123 = arith.mulf %113, %122 : vector<16x128xf32>
    %124 = vector.extract_strided_slice %22 {offsets = [0, 1], sizes = [16, 1], strides = [1, 1]} : vector<16x3xf32> to vector<16x1xf32>
    %125 = vector.broadcast %6 : vector<1x128xf32> to vector<16x128xf32>
    %126 = vector.broadcast %124 : vector<16x1xf32> to vector<16x128xf32>
    %127 = arith.addf %125, %126 : vector<16x128xf32>
    %128 = arith.subf %127, %123 : vector<16x128xf32>
    %129 = arith.divf %123, %128 : vector<16x128xf32>
    %cst_30 = arith.constant dense<0xFF800000> : vector<16xf32>
    %130 = vector.multi_reduction <maximumf>, %129, %cst_30 [1] : vector<16x128xf32> to vector<16xf32>
    %131 = vector.shape_cast %130 : vector<16xf32> to vector<16x1xf32>
    %132 = vector.broadcast %131 : vector<16x1xf32> to vector<16x128xf32>
    %133 = arith.cmpf oeq, %129, %132 : vector<16x128xf32>
    %c128_i32_31 = arith.constant 128 : i32
    %134 = vector.shape_cast %0 : vector<1x128xi32> to vector<1x128xi32>
    %135 = vector.broadcast %134 : vector<1x128xi32> to vector<16x128xi32>
    %136 = vector.broadcast %c128_i32_31 : i32 to vector<16x128xi32>
    %137 = arith.select %133, %135, %136 : vector<16x128xi1>, vector<16x128xi32>
    %cst_32 = arith.constant dense<2147483647> : vector<16xi32>
    %138 = vector.multi_reduction <minsi>, %137, %cst_32 [1] : vector<16x128xi32> to vector<16xi32>
    %139 = vector.shape_cast %138 : vector<16xi32> to vector<16x1xi32>
    %140 = vector.broadcast %0 : vector<1x128xi32> to vector<16x128xi32>
    %141 = vector.broadcast %139 : vector<16x1xi32> to vector<16x128xi32>
    %142 = arith.cmpi eq, %140, %141 : vector<16x128xi32>
    %cst_33 = arith.constant 2.001000e+00 : f32
    %143 = vector.broadcast %cst_33 : f32 to vector<16x128xf32>
    %144 = arith.select %142, %143, %129 : vector<16x128xi1>, vector<16x128xf32>
    %145 = arith.cmpf ogt, %144, %80 : vector<16x128xf32>
    %146 = arith.select %145, %144, %80 : vector<16x128xi1>, vector<16x128xf32>
    %147 = vector.extract_strided_slice %24 {offsets = [0, 1], sizes = [16, 1], strides = [1, 1]} : vector<16x3xf32> to vector<16x1xf32>
    %148 = vector.shape_cast %147 : vector<16x1xf32> to vector<16x1xf32>
    %149 = vector.broadcast %148 : vector<16x1xf32> to vector<16x128xf32>
    %150 = arith.select %145, %149, %84 : vector<16x128xi1>, vector<16x128xf32>
    %151 = vector.extract_strided_slice %26 {offsets = [0, 1], sizes = [16, 1], strides = [1, 1]} : vector<16x3xf32> to vector<16x1xf32>
    %152 = vector.shape_cast %151 : vector<16x1xf32> to vector<16x1xf32>
    %153 = vector.broadcast %152 : vector<16x1xf32> to vector<16x128xf32>
    %154 = arith.select %145, %153, %88 : vector<16x128xi1>, vector<16x128xf32>
    %155 = vector.extract_strided_slice %28 {offsets = [0, 1], sizes = [16, 1], strides = [1, 1]} : vector<16x3xf32> to vector<16x1xf32>
    %156 = vector.shape_cast %155 : vector<16x1xf32> to vector<16x1xf32>
    %157 = vector.broadcast %156 : vector<16x1xf32> to vector<16x128xf32>
    %158 = arith.select %145, %157, %92 : vector<16x128xi1>, vector<16x128xf32>
    %159 = vector.extract_strided_slice %30 {offsets = [0, 1], sizes = [16, 1], strides = [1, 1]} : vector<16x3xf32> to vector<16x1xf32>
    %160 = vector.shape_cast %159 : vector<16x1xf32> to vector<16x1xf32>
    %161 = vector.broadcast %160 : vector<16x1xf32> to vector<16x128xf32>
    %162 = arith.select %145, %161, %96 : vector<16x128xi1>, vector<16x128xf32>
    %163 = vector.extract_strided_slice %32 {offsets = [0, 1], sizes = [16, 1], strides = [1, 1]} : vector<16x3xf32> to vector<16x1xf32>
    %164 = vector.shape_cast %163 : vector<16x1xf32> to vector<16x1xf32>
    %165 = vector.broadcast %164 : vector<16x1xf32> to vector<16x128xf32>
    %166 = arith.select %145, %165, %100 : vector<16x128xi1>, vector<16x128xf32>
    %167 = vector.extract_strided_slice %14 {offsets = [0, 2], sizes = [16, 1], strides = [1, 1]} : vector<16x3xf32> to vector<16x1xf32>
    %168 = vector.extract_strided_slice %16 {offsets = [0, 2], sizes = [16, 1], strides = [1, 1]} : vector<16x3xf32> to vector<16x1xf32>
    %169 = vector.extract_strided_slice %18 {offsets = [0, 2], sizes = [16, 1], strides = [1, 1]} : vector<16x3xf32> to vector<16x1xf32>
    %170 = vector.extract_strided_slice %20 {offsets = [0, 2], sizes = [16, 1], strides = [1, 1]} : vector<16x3xf32> to vector<16x1xf32>
    %171 = vector.broadcast %4 : vector<1x128xf32> to vector<16x128xf32>
    %172 = vector.broadcast %169 : vector<16x1xf32> to vector<16x128xf32>
    %173 = arith.minimumf %171, %172 : vector<16x128xf32>
    %174 = vector.broadcast %2 : vector<1x128xf32> to vector<16x128xf32>
    %175 = vector.broadcast %167 : vector<16x1xf32> to vector<16x128xf32>
    %176 = arith.maximumf %174, %175 : vector<16x128xf32>
    %177 = arith.subf %173, %176 : vector<16x128xf32>
    %cst_34 = arith.constant 0.000000e+00 : f32
    %178 = vector.broadcast %cst_34 : f32 to vector<16x128xf32>
    %179 = arith.maximumf %177, %178 : vector<16x128xf32>
    %180 = vector.broadcast %5 : vector<1x128xf32> to vector<16x128xf32>
    %181 = vector.broadcast %170 : vector<16x1xf32> to vector<16x128xf32>
    %182 = arith.minimumf %180, %181 : vector<16x128xf32>
    %183 = vector.broadcast %3 : vector<1x128xf32> to vector<16x128xf32>
    %184 = vector.broadcast %168 : vector<16x1xf32> to vector<16x128xf32>
    %185 = arith.maximumf %183, %184 : vector<16x128xf32>
    %186 = arith.subf %182, %185 : vector<16x128xf32>
    %cst_35 = arith.constant 0.000000e+00 : f32
    %187 = vector.broadcast %cst_35 : f32 to vector<16x128xf32>
    %188 = arith.maximumf %186, %187 : vector<16x128xf32>
    %189 = arith.mulf %179, %188 : vector<16x128xf32>
    %190 = vector.extract_strided_slice %22 {offsets = [0, 2], sizes = [16, 1], strides = [1, 1]} : vector<16x3xf32> to vector<16x1xf32>
    %191 = vector.broadcast %6 : vector<1x128xf32> to vector<16x128xf32>
    %192 = vector.broadcast %190 : vector<16x1xf32> to vector<16x128xf32>
    %193 = arith.addf %191, %192 : vector<16x128xf32>
    %194 = arith.subf %193, %189 : vector<16x128xf32>
    %195 = arith.divf %189, %194 : vector<16x128xf32>
    %cst_36 = arith.constant dense<0xFF800000> : vector<16xf32>
    %196 = vector.multi_reduction <maximumf>, %195, %cst_36 [1] : vector<16x128xf32> to vector<16xf32>
    %197 = vector.shape_cast %196 : vector<16xf32> to vector<16x1xf32>
    %198 = vector.broadcast %197 : vector<16x1xf32> to vector<16x128xf32>
    %199 = arith.cmpf oeq, %195, %198 : vector<16x128xf32>
    %c128_i32_37 = arith.constant 128 : i32
    %200 = vector.shape_cast %0 : vector<1x128xi32> to vector<1x128xi32>
    %201 = vector.broadcast %200 : vector<1x128xi32> to vector<16x128xi32>
    %202 = vector.broadcast %c128_i32_37 : i32 to vector<16x128xi32>
    %203 = arith.select %199, %201, %202 : vector<16x128xi1>, vector<16x128xi32>
    %cst_38 = arith.constant dense<2147483647> : vector<16xi32>
    %204 = vector.multi_reduction <minsi>, %203, %cst_38 [1] : vector<16x128xi32> to vector<16xi32>
    %205 = vector.shape_cast %204 : vector<16xi32> to vector<16x1xi32>
    %206 = vector.broadcast %0 : vector<1x128xi32> to vector<16x128xi32>
    %207 = vector.broadcast %205 : vector<16x1xi32> to vector<16x128xi32>
    %208 = arith.cmpi eq, %206, %207 : vector<16x128xi32>
    %cst_39 = arith.constant 2.002000e+00 : f32
    %209 = vector.broadcast %cst_39 : f32 to vector<16x128xf32>
    %210 = arith.select %208, %209, %195 : vector<16x128xi1>, vector<16x128xf32>
    %211 = arith.cmpf ogt, %210, %146 : vector<16x128xf32>
    %212 = arith.select %211, %210, %146 : vector<16x128xi1>, vector<16x128xf32>
    %213 = vector.extract_strided_slice %24 {offsets = [0, 2], sizes = [16, 1], strides = [1, 1]} : vector<16x3xf32> to vector<16x1xf32>
    %214 = vector.shape_cast %213 : vector<16x1xf32> to vector<16x1xf32>
    %215 = vector.broadcast %214 : vector<16x1xf32> to vector<16x128xf32>
    %216 = arith.select %211, %215, %150 : vector<16x128xi1>, vector<16x128xf32>
    %217 = vector.extract_strided_slice %26 {offsets = [0, 2], sizes = [16, 1], strides = [1, 1]} : vector<16x3xf32> to vector<16x1xf32>
    %218 = vector.shape_cast %217 : vector<16x1xf32> to vector<16x1xf32>
    %219 = vector.broadcast %218 : vector<16x1xf32> to vector<16x128xf32>
    %220 = arith.select %211, %219, %154 : vector<16x128xi1>, vector<16x128xf32>
    %221 = vector.extract_strided_slice %28 {offsets = [0, 2], sizes = [16, 1], strides = [1, 1]} : vector<16x3xf32> to vector<16x1xf32>
    %222 = vector.shape_cast %221 : vector<16x1xf32> to vector<16x1xf32>
    %223 = vector.broadcast %222 : vector<16x1xf32> to vector<16x128xf32>
    %224 = arith.select %211, %223, %158 : vector<16x128xi1>, vector<16x128xf32>
    %225 = vector.extract_strided_slice %30 {offsets = [0, 2], sizes = [16, 1], strides = [1, 1]} : vector<16x3xf32> to vector<16x1xf32>
    %226 = vector.shape_cast %225 : vector<16x1xf32> to vector<16x1xf32>
    %227 = vector.broadcast %226 : vector<16x1xf32> to vector<16x128xf32>
    %228 = arith.select %211, %227, %162 : vector<16x128xi1>, vector<16x128xf32>
    %229 = vector.extract_strided_slice %32 {offsets = [0, 2], sizes = [16, 1], strides = [1, 1]} : vector<16x3xf32> to vector<16x1xf32>
    %230 = vector.shape_cast %229 : vector<16x1xf32> to vector<16x1xf32>
    %231 = vector.broadcast %230 : vector<16x1xf32> to vector<16x128xf32>
    %232 = arith.select %211, %231, %166 : vector<16x128xi1>, vector<16x128xf32>
    %cst_40 = arith.constant 5.000000e-01 : f32
    %233 = vector.broadcast %cst_40 : f32 to vector<16x128xf32>
    %234 = arith.cmpf olt, %212, %233 : vector<16x128xf32>
    %cst_41 = arith.constant 0.000000e+00 : f32
    %235 = vector.broadcast %cst_41 : f32 to vector<16x128xf32>
    %236 = arith.select %234, %235, %232 : vector<16x128xi1>, vector<16x128xf32>
    %cst_42 = arith.constant 0.000000e+00 : f32
    %237 = vector.broadcast %cst_42 : f32 to vector<16x128xf32>
    %238 = arith.cmpf one, %236, %237 : vector<16x128xf32>
    %cst_43 = arith.constant 1.000000e+00 : f32
    %cst_44 = arith.constant 0.000000e+00 : f32
    %239 = vector.broadcast %cst_43 : f32 to vector<16x128xf32>
    %240 = vector.broadcast %cst_44 : f32 to vector<16x128xf32>
    %241 = arith.select %238, %239, %240 : vector<16x128xi1>, vector<16x128xf32>
    %cst_45 = arith.constant dense<0.000000e+00> : vector<16xf32>
    %242 = vector.multi_reduction <add>, %241, %cst_45 [1] : vector<16x128xf32> to vector<16xf32>
    %243 = vector.shape_cast %242 : vector<16xf32> to vector<16x1xf32>
    %244 = vector.broadcast %7 : vector<1x128xf32> to vector<16x128xf32>
    %245 = arith.subf %216, %244 : vector<16x128xf32>
    %246 = vector.broadcast %9 : vector<1x128xf32> to vector<16x128xf32>
    %247 = arith.mulf %245, %246 : vector<16x128xf32>
    %248 = vector.broadcast %8 : vector<1x128xf32> to vector<16x128xf32>
    %249 = arith.subf %220, %248 : vector<16x128xf32>
    %250 = vector.broadcast %10 : vector<1x128xf32> to vector<16x128xf32>
    %251 = arith.mulf %249, %250 : vector<16x128xf32>
    %252 = vector.broadcast %11 : vector<1x128xf32> to vector<16x128xf32>
    %253 = arith.subf %224, %252 : vector<16x128xf32>
    %254 = vector.broadcast %12 : vector<1x128xf32> to vector<16x128xf32>
    %255 = arith.subf %228, %254 : vector<16x128xf32>
    %c0_46 = arith.constant 0 : index
    %c0_47 = arith.constant 0 : index
    %c0_48 = arith.constant 0 : index
    %256 = vector.load %arg2[%c0_46, %c0_47, %c0_48] : memref<4x16x128xbf16, #tpu.memory_space<vmem>>, vector<1x16x128xbf16>
    %257 = vector.shape_cast %256 : vector<1x16x128xbf16> to vector<16x128xbf16>
    %258 = arith.extf %257 : vector<16x128xbf16> to vector<16x128xf32>
    %259 = arith.subf %258, %247 : vector<16x128xf32>
    %260 = math.absf %259 : vector<16x128xf32>
    %c1_49 = arith.constant 1 : index
    %c0_50 = arith.constant 0 : index
    %c0_51 = arith.constant 0 : index
    %261 = vector.load %arg2[%c1_49, %c0_50, %c0_51] : memref<4x16x128xbf16, #tpu.memory_space<vmem>>, vector<1x16x128xbf16>
    %262 = vector.shape_cast %261 : vector<1x16x128xbf16> to vector<16x128xbf16>
    %263 = arith.extf %262 : vector<16x128xbf16> to vector<16x128xf32>
    %264 = arith.subf %263, %251 : vector<16x128xf32>
    %265 = math.absf %264 : vector<16x128xf32>
    %266 = arith.addf %260, %265 : vector<16x128xf32>
    %c2_52 = arith.constant 2 : index
    %c0_53 = arith.constant 0 : index
    %c0_54 = arith.constant 0 : index
    %267 = vector.load %arg2[%c2_52, %c0_53, %c0_54] : memref<4x16x128xbf16, #tpu.memory_space<vmem>>, vector<1x16x128xbf16>
    %268 = vector.shape_cast %267 : vector<1x16x128xbf16> to vector<16x128xbf16>
    %269 = arith.extf %268 : vector<16x128xbf16> to vector<16x128xf32>
    %270 = arith.subf %269, %253 : vector<16x128xf32>
    %271 = math.absf %270 : vector<16x128xf32>
    %272 = arith.addf %266, %271 : vector<16x128xf32>
    %c3_55 = arith.constant 3 : index
    %c0_56 = arith.constant 0 : index
    %c0_57 = arith.constant 0 : index
    %273 = vector.load %arg2[%c3_55, %c0_56, %c0_57] : memref<4x16x128xbf16, #tpu.memory_space<vmem>>, vector<1x16x128xbf16>
    %274 = vector.shape_cast %273 : vector<1x16x128xbf16> to vector<16x128xbf16>
    %275 = arith.extf %274 : vector<16x128xbf16> to vector<16x128xf32>
    %276 = arith.subf %275, %255 : vector<16x128xf32>
    %277 = math.absf %276 : vector<16x128xf32>
    %278 = arith.addf %272, %277 : vector<16x128xf32>
    %cst_58 = arith.constant 0.000000e+00 : f32
    %279 = vector.broadcast %cst_58 : f32 to vector<16x128xf32>
    %280 = arith.select %238, %278, %279 : vector<16x128xi1>, vector<16x128xf32>
    %cst_59 = arith.constant dense<0.000000e+00> : vector<16xf32>
    %281 = vector.multi_reduction <add>, %280, %cst_59 [1] : vector<16x128xf32> to vector<16xf32>
    %282 = vector.shape_cast %281 : vector<16xf32> to vector<16x1xf32>
    %c0_60 = arith.constant 0 : index
    %c0_61 = arith.constant 0 : index
    %c0_62 = arith.constant 0 : index
    %283 = vector.load %arg3[%c0_60, %c0_61, %c0_62] : memref<8x16x128xbf16, #tpu.memory_space<vmem>>, vector<1x16x128xbf16>
    %284 = vector.shape_cast %283 : vector<1x16x128xbf16> to vector<16x128xbf16>
    %285 = arith.extf %284 : vector<16x128xbf16> to vector<16x128xf32>
    %c1_63 = arith.constant 1 : index
    %c0_64 = arith.constant 0 : index
    %c0_65 = arith.constant 0 : index
    %286 = vector.load %arg3[%c1_63, %c0_64, %c0_65] : memref<8x16x128xbf16, #tpu.memory_space<vmem>>, vector<1x16x128xbf16>
    %287 = vector.shape_cast %286 : vector<1x16x128xbf16> to vector<16x128xbf16>
    %288 = arith.extf %287 : vector<16x128xbf16> to vector<16x128xf32>
    %289 = arith.maximumf %285, %288 : vector<16x128xf32>
    %c2_66 = arith.constant 2 : index
    %c0_67 = arith.constant 0 : index
    %c0_68 = arith.constant 0 : index
    %290 = vector.load %arg3[%c2_66, %c0_67, %c0_68] : memref<8x16x128xbf16, #tpu.memory_space<vmem>>, vector<1x16x128xbf16>
    %291 = vector.shape_cast %290 : vector<1x16x128xbf16> to vector<16x128xbf16>
    %292 = arith.extf %291 : vector<16x128xbf16> to vector<16x128xf32>
    %293 = arith.maximumf %289, %292 : vector<16x128xf32>
    %c3_69 = arith.constant 3 : index
    %c0_70 = arith.constant 0 : index
    %c0_71 = arith.constant 0 : index
    %294 = vector.load %arg3[%c3_69, %c0_70, %c0_71] : memref<8x16x128xbf16, #tpu.memory_space<vmem>>, vector<1x16x128xbf16>
    %295 = vector.shape_cast %294 : vector<1x16x128xbf16> to vector<16x128xbf16>
    %296 = arith.extf %295 : vector<16x128xbf16> to vector<16x128xf32>
    %297 = arith.maximumf %293, %296 : vector<16x128xf32>
    %c4_72 = arith.constant 4 : index
    %c0_73 = arith.constant 0 : index
    %c0_74 = arith.constant 0 : index
    %298 = vector.load %arg3[%c4_72, %c0_73, %c0_74] : memref<8x16x128xbf16, #tpu.memory_space<vmem>>, vector<1x16x128xbf16>
    %299 = vector.shape_cast %298 : vector<1x16x128xbf16> to vector<16x128xbf16>
    %300 = arith.extf %299 : vector<16x128xbf16> to vector<16x128xf32>
    %301 = arith.maximumf %297, %300 : vector<16x128xf32>
    %c5_75 = arith.constant 5 : index
    %c0_76 = arith.constant 0 : index
    %c0_77 = arith.constant 0 : index
    %302 = vector.load %arg3[%c5_75, %c0_76, %c0_77] : memref<8x16x128xbf16, #tpu.memory_space<vmem>>, vector<1x16x128xbf16>
    %303 = vector.shape_cast %302 : vector<1x16x128xbf16> to vector<16x128xbf16>
    %304 = arith.extf %303 : vector<16x128xbf16> to vector<16x128xf32>
    %305 = arith.maximumf %301, %304 : vector<16x128xf32>
    %c6_78 = arith.constant 6 : index
    %c0_79 = arith.constant 0 : index
    %c0_80 = arith.constant 0 : index
    %306 = vector.load %arg3[%c6_78, %c0_79, %c0_80] : memref<8x16x128xbf16, #tpu.memory_space<vmem>>, vector<1x16x128xbf16>
    %307 = vector.shape_cast %306 : vector<1x16x128xbf16> to vector<16x128xbf16>
    %308 = arith.extf %307 : vector<16x128xbf16> to vector<16x128xf32>
    %309 = arith.maximumf %305, %308 : vector<16x128xf32>
    %c7_81 = arith.constant 7 : index
    %c0_82 = arith.constant 0 : index
    %c0_83 = arith.constant 0 : index
    %310 = vector.load %arg3[%c7_81, %c0_82, %c0_83] : memref<8x16x128xbf16, #tpu.memory_space<vmem>>, vector<1x16x128xbf16>
    %311 = vector.shape_cast %310 : vector<1x16x128xbf16> to vector<16x128xbf16>
    %312 = arith.extf %311 : vector<16x128xbf16> to vector<16x128xf32>
    %313 = arith.maximumf %309, %312 : vector<16x128xf32>
    %cst_84 = arith.constant 0.000000e+00 : f32
    %314 = vector.broadcast %cst_84 : f32 to vector<16x128xf32>
    %cst_85 = arith.constant 0.000000e+00 : f32
    %315 = vector.broadcast %cst_85 : f32 to vector<16x128xf32>
    %c0_86 = arith.constant 0 : index
    %c0_87 = arith.constant 0 : index
    %c0_88 = arith.constant 0 : index
    %316 = vector.load %arg3[%c0_86, %c0_87, %c0_88] : memref<8x16x128xbf16, #tpu.memory_space<vmem>>, vector<1x16x128xbf16>
    %317 = vector.shape_cast %316 : vector<1x16x128xbf16> to vector<16x128xbf16>
    %318 = arith.extf %317 : vector<16x128xbf16> to vector<16x128xf32>
    %319 = arith.subf %318, %313 : vector<16x128xf32>
    %320 = math.exp %319 : vector<16x128xf32>
    %321 = arith.addf %314, %320 : vector<16x128xf32>
    %cst_89 = arith.constant 0.000000e+00 : f32
    %322 = vector.broadcast %cst_89 : f32 to vector<16x128xf32>
    %323 = arith.cmpf oeq, %236, %322 : vector<16x128xf32>
    %324 = arith.select %323, %318, %315 : vector<16x128xi1>, vector<16x128xf32>
    %c1_90 = arith.constant 1 : index
    %c0_91 = arith.constant 0 : index
    %c0_92 = arith.constant 0 : index
    %325 = vector.load %arg3[%c1_90, %c0_91, %c0_92] : memref<8x16x128xbf16, #tpu.memory_space<vmem>>, vector<1x16x128xbf16>
    %326 = vector.shape_cast %325 : vector<1x16x128xbf16> to vector<16x128xbf16>
    %327 = arith.extf %326 : vector<16x128xbf16> to vector<16x128xf32>
    %328 = arith.subf %327, %313 : vector<16x128xf32>
    %329 = math.exp %328 : vector<16x128xf32>
    %330 = arith.addf %321, %329 : vector<16x128xf32>
    %cst_93 = arith.constant 1.000000e+00 : f32
    %331 = vector.broadcast %cst_93 : f32 to vector<16x128xf32>
    %332 = arith.cmpf oeq, %236, %331 : vector<16x128xf32>
    %333 = arith.select %332, %327, %324 : vector<16x128xi1>, vector<16x128xf32>
    %c2_94 = arith.constant 2 : index
    %c0_95 = arith.constant 0 : index
    %c0_96 = arith.constant 0 : index
    %334 = vector.load %arg3[%c2_94, %c0_95, %c0_96] : memref<8x16x128xbf16, #tpu.memory_space<vmem>>, vector<1x16x128xbf16>
    %335 = vector.shape_cast %334 : vector<1x16x128xbf16> to vector<16x128xbf16>
    %336 = arith.extf %335 : vector<16x128xbf16> to vector<16x128xf32>
    %337 = arith.subf %336, %313 : vector<16x128xf32>
    %338 = math.exp %337 : vector<16x128xf32>
    %339 = arith.addf %330, %338 : vector<16x128xf32>
    %cst_97 = arith.constant 2.000000e+00 : f32
    %340 = vector.broadcast %cst_97 : f32 to vector<16x128xf32>
    %341 = arith.cmpf oeq, %236, %340 : vector<16x128xf32>
    %342 = arith.select %341, %336, %333 : vector<16x128xi1>, vector<16x128xf32>
    %c3_98 = arith.constant 3 : index
    %c0_99 = arith.constant 0 : index
    %c0_100 = arith.constant 0 : index
    %343 = vector.load %arg3[%c3_98, %c0_99, %c0_100] : memref<8x16x128xbf16, #tpu.memory_space<vmem>>, vector<1x16x128xbf16>
    %344 = vector.shape_cast %343 : vector<1x16x128xbf16> to vector<16x128xbf16>
    %345 = arith.extf %344 : vector<16x128xbf16> to vector<16x128xf32>
    %346 = arith.subf %345, %313 : vector<16x128xf32>
    %347 = math.exp %346 : vector<16x128xf32>
    %348 = arith.addf %339, %347 : vector<16x128xf32>
    %cst_101 = arith.constant 3.000000e+00 : f32
    %349 = vector.broadcast %cst_101 : f32 to vector<16x128xf32>
    %350 = arith.cmpf oeq, %236, %349 : vector<16x128xf32>
    %351 = arith.select %350, %345, %342 : vector<16x128xi1>, vector<16x128xf32>
    %c4_102 = arith.constant 4 : index
    %c0_103 = arith.constant 0 : index
    %c0_104 = arith.constant 0 : index
    %352 = vector.load %arg3[%c4_102, %c0_103, %c0_104] : memref<8x16x128xbf16, #tpu.memory_space<vmem>>, vector<1x16x128xbf16>
    %353 = vector.shape_cast %352 : vector<1x16x128xbf16> to vector<16x128xbf16>
    %354 = arith.extf %353 : vector<16x128xbf16> to vector<16x128xf32>
    %355 = arith.subf %354, %313 : vector<16x128xf32>
    %356 = math.exp %355 : vector<16x128xf32>
    %357 = arith.addf %348, %356 : vector<16x128xf32>
    %cst_105 = arith.constant 4.000000e+00 : f32
    %358 = vector.broadcast %cst_105 : f32 to vector<16x128xf32>
    %359 = arith.cmpf oeq, %236, %358 : vector<16x128xf32>
    %360 = arith.select %359, %354, %351 : vector<16x128xi1>, vector<16x128xf32>
    %c5_106 = arith.constant 5 : index
    %c0_107 = arith.constant 0 : index
    %c0_108 = arith.constant 0 : index
    %361 = vector.load %arg3[%c5_106, %c0_107, %c0_108] : memref<8x16x128xbf16, #tpu.memory_space<vmem>>, vector<1x16x128xbf16>
    %362 = vector.shape_cast %361 : vector<1x16x128xbf16> to vector<16x128xbf16>
    %363 = arith.extf %362 : vector<16x128xbf16> to vector<16x128xf32>
    %364 = arith.subf %363, %313 : vector<16x128xf32>
    %365 = math.exp %364 : vector<16x128xf32>
    %366 = arith.addf %357, %365 : vector<16x128xf32>
    %cst_109 = arith.constant 5.000000e+00 : f32
    %367 = vector.broadcast %cst_109 : f32 to vector<16x128xf32>
    %368 = arith.cmpf oeq, %236, %367 : vector<16x128xf32>
    %369 = arith.select %368, %363, %360 : vector<16x128xi1>, vector<16x128xf32>
    %c6_110 = arith.constant 6 : index
    %c0_111 = arith.constant 0 : index
    %c0_112 = arith.constant 0 : index
    %370 = vector.load %arg3[%c6_110, %c0_111, %c0_112] : memref<8x16x128xbf16, #tpu.memory_space<vmem>>, vector<1x16x128xbf16>
    %371 = vector.shape_cast %370 : vector<1x16x128xbf16> to vector<16x128xbf16>
    %372 = arith.extf %371 : vector<16x128xbf16> to vector<16x128xf32>
    %373 = arith.subf %372, %313 : vector<16x128xf32>
    %374 = math.exp %373 : vector<16x128xf32>
    %375 = arith.addf %366, %374 : vector<16x128xf32>
    %cst_113 = arith.constant 6.000000e+00 : f32
    %376 = vector.broadcast %cst_113 : f32 to vector<16x128xf32>
    %377 = arith.cmpf oeq, %236, %376 : vector<16x128xf32>
    %378 = arith.select %377, %372, %369 : vector<16x128xi1>, vector<16x128xf32>
    %c7_114 = arith.constant 7 : index
    %c0_115 = arith.constant 0 : index
    %c0_116 = arith.constant 0 : index
    %379 = vector.load %arg3[%c7_114, %c0_115, %c0_116] : memref<8x16x128xbf16, #tpu.memory_space<vmem>>, vector<1x16x128xbf16>
    %380 = vector.shape_cast %379 : vector<1x16x128xbf16> to vector<16x128xbf16>
    %381 = arith.extf %380 : vector<16x128xbf16> to vector<16x128xf32>
    %382 = arith.subf %381, %313 : vector<16x128xf32>
    %383 = math.exp %382 : vector<16x128xf32>
    %384 = arith.addf %375, %383 : vector<16x128xf32>
    %cst_117 = arith.constant 7.000000e+00 : f32
    %385 = vector.broadcast %cst_117 : f32 to vector<16x128xf32>
    %386 = arith.cmpf oeq, %236, %385 : vector<16x128xf32>
    %387 = arith.select %386, %381, %378 : vector<16x128xi1>, vector<16x128xf32>
    %388 = math.log %384 : vector<16x128xf32>
    %389 = arith.addf %388, %313 : vector<16x128xf32>
    %390 = arith.subf %389, %387 : vector<16x128xf32>
    %cst_118 = arith.constant 0.000000e+00 : f32
    %391 = vector.broadcast %cst_118 : f32 to vector<16x128xf32>
    %392 = arith.select %238, %390, %391 : vector<16x128xi1>, vector<16x128xf32>
    %cst_119 = arith.constant dense<0.000000e+00> : vector<16xf32>
    %393 = vector.multi_reduction <add>, %392, %cst_119 [1] : vector<16x128xf32> to vector<16xf32>
    %394 = vector.shape_cast %393 : vector<16xf32> to vector<16x1xf32>
    %cst_120 = arith.constant 0.000000e+00 : f32
    %395 = vector.broadcast %cst_120 : f32 to vector<16x128xf32>
    %396 = arith.select %238, %395, %390 : vector<16x128xi1>, vector<16x128xf32>
    %cst_121 = arith.constant 3.000000e+00 : f32
    %397 = vector.broadcast %cst_121 : f32 to vector<16x1xf32>
    %398 = arith.mulf %397, %243 : vector<16x1xf32>
    %cst_122 = arith.constant 1.280000e+02 : f32
    %399 = vector.broadcast %cst_122 : f32 to vector<16x1xf32>
    %400 = arith.minimumf %398, %399 : vector<16x1xf32>
    %cst_123 = arith.constant dense<0xFF800000> : vector<16xf32>
    %401 = vector.multi_reduction <maximumf>, %396, %cst_123 [1] : vector<16x128xf32> to vector<16xf32>
    %402 = vector.shape_cast %401 : vector<16xf32> to vector<16x1xf32>
    %cst_124 = arith.constant 0.000000e+00 : f32
    %403 = vector.broadcast %cst_124 : f32 to vector<16x1xf32>
    %c0_i32 = arith.constant 0 : i32
    %c24_i32 = arith.constant 24 : i32
    %404 = arith.addi %c0_i32, %c24_i32 : i32
    %c1_i32 = arith.constant 1 : i32
    %405:2 = scf.for %arg6 = %c0_i32 to %404 step %c1_i32 iter_args(%arg7 = %403, %arg8 = %402) -> (vector<16x1xf32>, vector<16x1xf32>)  : i32 {
      %459 = arith.addf %arg7, %arg8 : vector<16x1xf32>
      %cst_139 = arith.constant 5.000000e-01 : f32
      %460 = vector.broadcast %cst_139 : f32 to vector<16x1xf32>
      %461 = arith.mulf %459, %460 : vector<16x1xf32>
      %462 = vector.broadcast %461 : vector<16x1xf32> to vector<16x128xf32>
      %463 = arith.cmpf ogt, %396, %462 : vector<16x128xf32>
      %cst_140 = arith.constant 1.000000e+00 : f32
      %cst_141 = arith.constant 0.000000e+00 : f32
      %464 = vector.broadcast %cst_140 : f32 to vector<16x128xf32>
      %465 = vector.broadcast %cst_141 : f32 to vector<16x128xf32>
      %466 = arith.select %463, %464, %465 : vector<16x128xi1>, vector<16x128xf32>
      %cst_142 = arith.constant dense<0.000000e+00> : vector<16xf32>
      %467 = vector.multi_reduction <add>, %466, %cst_142 [1] : vector<16x128xf32> to vector<16xf32>
      %468 = vector.shape_cast %467 : vector<16xf32> to vector<16x1xf32>
      %469 = arith.cmpf oge, %468, %400 : vector<16x1xf32>
      %470 = arith.select %469, %461, %arg7 : vector<16x1xi1>, vector<16x1xf32>
      %471 = arith.select %469, %arg8, %461 : vector<16x1xi1>, vector<16x1xf32>
      scf.yield %470, %471 : vector<16x1xf32>, vector<16x1xf32>
    }
    %406 = vector.broadcast %405#1 : vector<16x1xf32> to vector<16x128xf32>
    %407 = arith.cmpf ogt, %396, %406 : vector<16x128xf32>
    %cst_125 = arith.constant 1.000000e+00 : f32
    %cst_126 = arith.constant 0.000000e+00 : f32
    %408 = vector.broadcast %cst_125 : f32 to vector<16x128xf32>
    %409 = vector.broadcast %cst_126 : f32 to vector<16x128xf32>
    %410 = arith.select %407, %408, %409 : vector<16x128xi1>, vector<16x128xf32>
    %cst_127 = arith.constant dense<0.000000e+00> : vector<16xf32>
    %411 = vector.multi_reduction <add>, %410, %cst_127 [1] : vector<16x128xf32> to vector<16xf32>
    %412 = vector.shape_cast %411 : vector<16xf32> to vector<16x1xf32>
    %cst_128 = arith.constant 0.000000e+00 : f32
    %413 = vector.broadcast %cst_128 : f32 to vector<16x128xf32>
    %414 = arith.select %407, %396, %413 : vector<16x128xi1>, vector<16x128xf32>
    %cst_129 = arith.constant dense<0.000000e+00> : vector<16xf32>
    %415 = vector.multi_reduction <add>, %414, %cst_129 [1] : vector<16x128xf32> to vector<16xf32>
    %416 = vector.shape_cast %415 : vector<16xf32> to vector<16x1xf32>
    %417 = arith.subf %400, %412 : vector<16x1xf32>
    %cst_130 = arith.constant 0.000000e+00 : f32
    %418 = vector.broadcast %cst_130 : f32 to vector<16x1xf32>
    %419 = arith.maximumf %417, %418 : vector<16x1xf32>
    %420 = arith.mulf %419, %405#1 : vector<16x1xf32>
    %421 = arith.addf %416, %420 : vector<16x1xf32>
    %422 = tpu.iota {dimensions = array<i32: 1>} : vector<1x128xi32>
    %c0_i32_131 = arith.constant 0 : i32
    %423 = vector.broadcast %c0_i32_131 : i32 to vector<1x128xi32>
    %424 = arith.cmpi eq, %422, %423 : vector<1x128xi32>
    %cst_132 = arith.constant 0.000000e+00 : f32
    %425 = vector.shape_cast %424 : vector<1x128xi1> to vector<1x128xi1>
    %426 = vector.broadcast %425 : vector<1x128xi1> to vector<16x128xi1>
    %427 = vector.shape_cast %243 : vector<16x1xf32> to vector<16x1xf32>
    %428 = vector.broadcast %427 : vector<16x1xf32> to vector<16x128xf32>
    %429 = vector.broadcast %cst_132 : f32 to vector<16x128xf32>
    %430 = arith.select %426, %428, %429 : vector<16x128xi1>, vector<16x128xf32>
    %c1_i32_133 = arith.constant 1 : i32
    %431 = vector.broadcast %c1_i32_133 : i32 to vector<1x128xi32>
    %432 = arith.cmpi eq, %422, %431 : vector<1x128xi32>
    %cst_134 = arith.constant 0.000000e+00 : f32
    %433 = vector.shape_cast %432 : vector<1x128xi1> to vector<1x128xi1>
    %434 = vector.broadcast %433 : vector<1x128xi1> to vector<16x128xi1>
    %435 = vector.shape_cast %282 : vector<16x1xf32> to vector<16x1xf32>
    %436 = vector.broadcast %435 : vector<16x1xf32> to vector<16x128xf32>
    %437 = vector.broadcast %cst_134 : f32 to vector<16x128xf32>
    %438 = arith.select %434, %436, %437 : vector<16x128xi1>, vector<16x128xf32>
    %439 = arith.addf %430, %438 : vector<16x128xf32>
    %c2_i32 = arith.constant 2 : i32
    %440 = vector.broadcast %c2_i32 : i32 to vector<1x128xi32>
    %441 = arith.cmpi eq, %422, %440 : vector<1x128xi32>
    %cst_135 = arith.constant 0.000000e+00 : f32
    %442 = vector.shape_cast %441 : vector<1x128xi1> to vector<1x128xi1>
    %443 = vector.broadcast %442 : vector<1x128xi1> to vector<16x128xi1>
    %444 = vector.shape_cast %394 : vector<16x1xf32> to vector<16x1xf32>
    %445 = vector.broadcast %444 : vector<16x1xf32> to vector<16x128xf32>
    %446 = vector.broadcast %cst_135 : f32 to vector<16x128xf32>
    %447 = arith.select %443, %445, %446 : vector<16x128xi1>, vector<16x128xf32>
    %448 = arith.addf %439, %447 : vector<16x128xf32>
    %c3_i32 = arith.constant 3 : i32
    %449 = vector.broadcast %c3_i32 : i32 to vector<1x128xi32>
    %450 = arith.cmpi eq, %422, %449 : vector<1x128xi32>
    %cst_136 = arith.constant 0.000000e+00 : f32
    %451 = vector.shape_cast %450 : vector<1x128xi1> to vector<1x128xi1>
    %452 = vector.broadcast %451 : vector<1x128xi1> to vector<16x128xi1>
    %453 = vector.shape_cast %421 : vector<16x1xf32> to vector<16x1xf32>
    %454 = vector.broadcast %453 : vector<16x1xf32> to vector<16x128xf32>
    %455 = vector.broadcast %cst_136 : f32 to vector<16x128xf32>
    %456 = arith.select %452, %454, %455 : vector<16x128xi1>, vector<16x128xf32>
    %457 = arith.addf %448, %456 : vector<16x128xf32>
    %c0_137 = arith.constant 0 : index
    %c0_138 = arith.constant 0 : index
    %458 = vector.load %arg5[%c0_137, %c0_138] : memref<16x128xf32, #tpu.memory_space<vmem>>, vector<16x128xf32>
    tpu.vector_store %arg5[%c0_137, %c0_138], %457 {strides = array<i32>} : memref<16x128xf32, #tpu.memory_space<vmem>>, vector<16x128xf32>,
    return
  }
  func.func @transform_0(%arg0: i32) -> (i32, i32, i32) {
    %c0_i32 = arith.constant 0 : i32
    %c0_i32_0 = arith.constant 0 : i32
    %c0_i32_1 = arith.constant 0 : i32
    return %c0_i32, %arg0, %c0_i32_0 : i32, i32, i32
  }
  func.func @transform_1(%arg0: i32) -> (i32, i32, i32) {
    %c0_i32 = arith.constant 0 : i32
    %c0_i32_0 = arith.constant 0 : i32
    %c0_i32_1 = arith.constant 0 : i32
    return %c0_i32, %arg0, %c0_i32_0 : i32, i32, i32
  }
  func.func @transform_2(%arg0: i32) -> (i32, i32, i32) {
    %c0_i32 = arith.constant 0 : i32
    %c0_i32_0 = arith.constant 0 : i32
    %c0_i32_1 = arith.constant 0 : i32
    return %c0_i32, %arg0, %c0_i32_0 : i32, i32, i32
  }
  func.func @transform_3(%arg0: i32) -> (i32, i32) {
    %c0_i32 = arith.constant 0 : i32
    %c0_i32_0 = arith.constant 0 : i32
    %c0_i32_1 = arith.constant 0 : i32
    return %c0_i32, %c0_i32_0 : i32, i32
  }
  func.func @transform_4(%arg0: i32) -> (i32, i32) {
    %c0_i32 = arith.constant 0 : i32
    %c0_i32_0 = arith.constant 0 : i32
    return %arg0, %c0_i32 : i32, i32
  }
}

</mosaic_0001>

<bundles_post_ra>
// kernel: multibox_loss.1
= control target key start
LH: loop header
LB: loop body
LE: loop exit
PB: predicated region body
PF: predicated region fallthrough
CT: control target
= control target key end

     0   :  { %v1188_v0 = vmov 2   ;;  %v1189_v1 = vmov 0   ;;  %v1190_v10 = vmov 1   ;;  %v17_v18 = vlaneseq  ;;  %s1980_s0 = inlined_call_operand.vmem [shape: f32[10,16,3], index: 0, kind: input, shape index: {}]   ;;  %s1981_s3 = inlined_call_operand.vmem [shape: f32[11,128], index: 3, kind: input, shape index: {}]   ;;  %s1982_s2 = inlined_call_operand.vmem [shape: bf16[8,16,128], index: 2, kind: input, shape index: {}]   ;;  %s1983_s1 = inlined_call_operand.vmem [shape: bf16[4,16,128], index: 1, kind: input, shape index: {}]   ;;  %s1984_s4 = inlined_call_operand.vmem [shape: f32[16,128], index: 4, kind: output, shape index: {}]  }
   0x1   :  { %1081 = vset.pattern.permute.xlu0 %v1188_v0  ;;  %1078 = vset.pattern.permute.xlu1 %v1189_v1  ;;  %v940_v2 = vld [vmem:[%s1980_s0 + $0x28] sm:$0xff]  ;;  %v21_v3 = vld [vmem:[%s1980_s0] sm:$0xff]  ;;  %v941_v4 = vld [vmem:[%s1980_s0 + $0x30] sm:$0xff] }
   0x2   :  { %415 = vperm.xlu0 %1081, %v940_v2   ;;  %72 = vperm.xlu1 %1078, %v21_v3   ;;  %v22_v5 = vld [vmem:[%s1980_s0 + $0x8] sm:$0xff]  ;;  %v937_v6 = vld [vmem:[%s1980_s0 + $0x10] sm:$0xff]  ;;  %v942_v7 = vld [vmem:[%s1980_s0 + $0x38] sm:$0xff]  ;;  %v1290_v19 = vshrl.u32 %v17_v18, 7 }
   0x3   :  { %v938_v8 = vld [vmem:[%s1980_s0 + $0x18] sm:$0xff]  ;;  %v939_v9 = vld [vmem:[%s1980_s0 + $0x20] sm:$0xff]  ;;  %v944_v12 = vld [vmem:[%s1980_s0 + $0x48] sm:$0xff] }
   0x4   :  { %v943_v11 = vld [vmem:[%s1980_s0 + $0x40] sm:$0xff]  ;;  %v1260_v13 = vld [vmem:[%s1980_s0 + $0x50] sm:$0xff]  ;;  %v1267_v14 = vld [vmem:[%s1980_s0 + $0x58] sm:$0xff]  ;;  %v1986_v20 = vsub.s32 2, %v1290_v19  ;;  %v1985_v32 = vsub.s32 0, %v1290_v19  ;;  %v88_v35 = vsub.s32 3, %v1290_v19 }
   0x5   :  { %v1273_v15 = vld [vmem:[%s1980_s0 + $0x68] sm:$0xff]  ;;  %v1279_v16 = vld [vmem:[%s1980_s0 + $0x70] sm:$0xff]  ;;  %v1285_v17 = vld [vmem:[%s1980_s0 + $0x78] sm:$0xff]  ;;  %v1987_v37 = vsub.s32 1, %v1290_v19  ;;  %v126_v45 = vsub.s32 4, %v1290_v19 }
   0x6   :  { %435 = vperm.xlu0 %1081, %v941_v4   ;;  %77 = vperm.xlu1 %1078, %v22_v5   ;;  %v1296_v21 = vld [vmem:[%s1981_s3] sm:$0xff] }
   0x7   :  { %v1301_v22 = vrot.slane %v1296_v21, %v1986_v20  ;;  %v1313_v36 = vrot.slane %v1296_v21, %v1985_v32  ;;  %v1317_v40 = vrot.slane %v1296_v21, %v88_v35  ;;  %v1324_v43 = vrot.slane %v1296_v21, %v1987_v37 }
   0x8   :  { %v1330_v51 = vrot.slane %v1296_v21, %v126_v45 }
   0xa   :  { %445 = vperm.xlu0 %1081, %v937_v6   ;;  %97 = vperm.xlu1 %1078, %v942_v7  }
   0xe   :  { %1082 = vset.pattern.permute.xlu0 %v1189_v1  ;;  %113 = vperm.xlu1 %1078, %v938_v8  }
   0xf   :  { %56 = vperm.xlu0 %1082, %v939_v9  }
  0x12   :  { %1079 = vset.pattern.permute.xlu1 %v1190_v10 }
  0x13   :  { %61 = vperm.xlu0 %1082, %v940_v2   ;;  %255 = vperm.xlu1 %1079, %v940_v2  }
  0x17   :  { %92 = vperm.xlu0 %1082, %v941_v4   ;;  %261 = vperm.xlu1 %1079, %v21_v3  }
  0x1b   :  { %108 = vperm.xlu0 %1082, %v937_v6   ;;  %275 = vperm.xlu1 %1079, %v941_v4  }
  0x1f   :  { %130 = vperm.xlu0 %1082, %v943_v11   ;;  %285 = vperm.xlu1 %1079, %v937_v6  }
  0x23   :  { %1083 = vset.pattern.permute.xlu0 %v1190_v10  ;;  %1080 = vset.pattern.permute.xlu1 %v1188_v0 }
  0x24   :  { %251 = vperm.xlu0 %1083, %v939_v9   ;;  %411 = vperm.xlu1 %1080, %v939_v9  }
  0x28   :  { %265 = vperm.xlu0 %1083, %v22_v5   ;;  %421 = vperm.xlu1 %1080, %v21_v3  }
  0x2c   :  { %279 = vperm.xlu0 %1083, %v942_v7   ;;  %425 = vperm.xlu1 %1080, %v22_v5  }
  0x30   :  { %289 = vperm.xlu0 %1083, %v938_v8   ;;  %439 = vperm.xlu1 %1080, %v942_v7  }
  0x34   :  { %305 = vperm.xlu0 %1083, %v944_v12   ;;  %449 = vperm.xlu1 %1080, %v938_v8  }
  0x38   :  { %1084 = vset.pattern.permute.xlu1 %v1189_v1 }
  0x39   :  { %135 = vperm.xlu1 %1084, %v944_v12  }
  0x3d   :  { %1085 = vset.pattern.permute.xlu1 %v1190_v10 }
  0x3e   :  { %301 = vperm.xlu1 %1085, %v943_v11  }
  0x42   :  { %1086 = vset.pattern.permute.xlu1 %v1188_v0 }
  0x43   :  { %461 = vperm.xlu1 %1086, %v943_v11  }
  0x47   :  { %465 = vperm.xlu1 %1086, %v944_v12  }
  0x4b   :  { %1087 = vset.pattern.permute.xlu1 %v1189_v1 }
  0x4c   :  { %192 = vperm.xlu1 %1087, %v1260_v13  }
  0x50   :  { %197 = vperm.xlu1 %1087, %v1267_v14  }
  0x54   :  { %209 = vperm.xlu1 %1087, %v1273_v15  }
  0x58   :  { %216 = vperm.xlu1 %1087, %v1279_v16  }
  0x5c   :  { %221 = vperm.xlu1 %1087, %v1285_v17  }
  0x60   :  { %1088 = vset.pattern.permute.xlu1 %v1190_v10 }
  0x81   :  { %v73_v23 = vpop.permute.xlu1 %72  ;;  %v416_v24 = vpop.permute.xlu0 %415 }
  0x82   :  { %v419_v25 = vmin.f32 %v1301_v22, %v416_v24  ;;  %v80_v42 = vmax.f32 %v1313_v36, %v73_v23 }
  0x85   :  { %v78_v26 = vpop.permute.xlu1 %77  ;;  %v1304_v27 = vpop.permute.xlu0 %435 }
  0x86   :  { %v81_v7 = vmax.f32 %v1313_v36, %v78_v26 }
  0x89   :  { %v98_v28 = vpop.permute.xlu1 %97  ;;  %v1306_v29 = vpop.permute.xlu0 %445 }
  0x8a   :  { %v101_v35 = vmin.f32 %v1317_v40, %v98_v28 }
  0x8d   :  { %v114_v30 = vpop.permute.xlu1 %113 }
  0x8e   :  { %v57_v31 = vpop.permute.xlu0 %56  ;;  %v117_v8 = vmax.f32 %v1324_v43, %v114_v30 }
  0x8f   :  { %v64_v41 = vmin.f32 %v1301_v22, %v57_v31 }
  0x90   :  { %v119_v26 = vsub.f32 %v101_v35, %v117_v8 }
  0x91   :  { %v82_v48 = vsub.f32 %v64_v41, %v80_v42 }
  0x92   :  { %v62_v33 = vpop.permute.xlu0 %61  ;;  %v256_v34 = vpop.permute.xlu1 %255 }
  0x93   :  { %v84_v54 = vmax.f32 %v82_v48, 0.0  ;;  %v65_v4 = vmin.f32 %v1301_v22, %v62_v33  ;;  %v259_v30 = vmin.f32 %v1301_v22, %v256_v34 }
  0x96   :  { %v93_v38 = vpop.permute.xlu0 %92  ;;  %v262_v39 = vpop.permute.xlu1 %261 }
  0x97   :  { %v100_v44 = vmin.f32 %v1317_v40, %v93_v38  ;;  %v83_v38 = vsub.f32 %v65_v4, %v81_v7  ;;  %v268_v42 = vmax.f32 %v1313_v36, %v262_v39 }
  0x99   :  { %v85_v48 = vmax.f32 %v83_v38, 0.0 }
  0x9a   :  { %v109_v46 = vpop.permute.xlu0 %108  ;;  %v276_v47 = vpop.permute.xlu1 %275 }
  0x9b   :  { %v116_v49 = vmax.f32 %v1324_v43, %v109_v46  ;;  %v282_v28 = vmin.f32 %v1317_v40, %v276_v47 }
  0x9d   :  { %v118_v50 = vsub.f32 %v100_v44, %v116_v49 }
  0x9e   :  { %v131_v52 = vpop.permute.xlu0 %130  ;;  %v286_v53 = vpop.permute.xlu1 %285 }
  0x9f   :  { %v120_v55 = vmax.f32 %v118_v50, 0.0  ;;  %v138_v57 = vadd.f32 %v131_v52, %v1330_v51  ;;  %v292_v44 = vmax.f32 %v1324_v43, %v286_v53 }
  0xa1   :  { %v122_v56 = vmul.f32 %v120_v55, %v84_v54  ;;  %v442_v54 = vmin.f32 %v1317_v40, %v1304_v27  ;;  %v121_v55 = vmax.f32 %v119_v26, 0.0 }
  0xa3   :  { %v140_v58 = vsub.f32 %v138_v57, %v122_v56  ;;  %v252_v59 = vpop.permute.xlu0 %251  ;;  %v412_v60 = vpop.permute.xlu1 %411  ;;  %v123_v47 = vmul.f32 %v121_v55, %v85_v48 }
  0xa5   :  { %1100 = vrcp.f32 %v140_v58 }
  0xa7   :  { %v266_v61 = vpop.permute.xlu0 %265  ;;  %v422_v62 = vpop.permute.xlu1 %421 }
  0xa8   :  { %v269_v33 = vmax.f32 %v1313_v36, %v266_v61  ;;  %v428_v34 = vmax.f32 %v1313_v36, %v422_v62  ;;  %v418_v61 = vmin.f32 %v1301_v22, %v412_v60 }
  0xaa   :  { %v271_v50 = vsub.f32 %v259_v30, %v269_v33  ;;  %v430_v27 = vsub.f32 %v418_v61, %v428_v34 }
  0xab   :  { %v280_v63 = vpop.permute.xlu0 %279  ;;  %v426_v2 = vpop.permute.xlu1 %425 }
  0xac   :  { %v429_v3 = vmax.f32 %v1313_v36, %v426_v2  ;;  %v283_v12 = vmin.f32 %v1317_v40, %v280_v63 }
  0xae   :  { %v431_v5 = vsub.f32 %v419_v25, %v429_v3  ;;  %v258_v25 = vmin.f32 %v1301_v22, %v252_v59  ;;  %v452_v59 = vmax.f32 %v1324_v43, %v1306_v29  ;;  %v273_v3 = vmax.f32 %v271_v50, 0.0  ;;  %v953_v50 = vld [vmem:[%s1980_s0 + $0x90] sm:$0xff] }
  0xaf   :  { %v1101_v6 = vpop.eup %1100  ;;  %v290_v9 = vpop.permute.xlu0 %289  ;;  %v432_v22 = vmax.f32 %v430_v27, 0.0 }
  0xb0   :  { %v440_v11 = vpop.permute.xlu1 %439  ;;  %v293_v23 = vmax.f32 %v1324_v43, %v290_v9  ;;  %v1340_v31 = vmul.f32 %v1101_v6, %v122_v56  ;;  %v270_v49 = vsub.f32 %v258_v25, %v268_v42  ;;  %v294_v56 = vsub.f32 %v282_v28, %v292_v44 }
  0xb1   :  { %v443_v24 = vmin.f32 %v1317_v40, %v440_v11  ;;  %v433_v57 = vmax.f32 %v431_v5, 0.0  ;;  %v454_v5 = vsub.f32 %v442_v54, %v452_v59 }
  0xb2   :  { %146 = vmax.xlane.f32.xlu0 %v1340_v31  ;;  %v295_v45 = vsub.f32 %v283_v12, %v293_v23  ;;  %v272_v2 = vmax.f32 %v270_v49, 0.0  ;;  %v296_v36 = vmax.f32 %v294_v56, 0.0  ;;  %v947_v49 = vld [vmem:[%s1980_s0 + $0x60] sm:$0xff] }
  0xb3   :  { %v306_v40 = vpop.permute.xlu0 %305  ;;  %v456_v11 = vmax.f32 %v454_v5, 0.0 }
  0xb4   :  { %v450_v41 = vpop.permute.xlu1 %449  ;;  %v297_v39 = vmax.f32 %v295_v45, 0.0  ;;  %v309_v8 = vadd.f32 %v306_v40, %v1330_v51  ;;  %v298_v9 = vmul.f32 %v296_v36, %v272_v2 }
  0xb5   :  { %v453_v46 = vmax.f32 %v1324_v43, %v450_v41  ;;  %v458_v23 = vmul.f32 %v456_v11, %v432_v22 }
  0xb6   :  { %v299_v62 = vmul.f32 %v297_v39, %v273_v3 }
  0xb7   :  { %v455_v52 = vsub.f32 %v443_v24, %v453_v46 }
  0xb8   :  { %v136_v53 = vpop.permute.xlu1 %135  ;;  %v311_v43 = vsub.f32 %v309_v8, %v299_v62  ;;  %v1462_v8 = vld [vmem:[%s1980_s0 + $0x88] sm:$0xff] }
  0xb9   :  { %v457_v58 = vmax.f32 %v455_v52, 0.0  ;;  %v139_v63 = vadd.f32 %v136_v53, %v1330_v51  ;;  %v1390_v52 = vld [vmem:[%s1980_s0 + $0x98] sm:$0xff] }
  0xbb   :  { %v459_v4 = vmul.f32 %v457_v58, %v433_v57  ;;  %v141_v6 = vsub.f32 %v139_v63, %v123_v47 }
  0xbd   :  { %1102 = vrcp.f32 %v141_v6  ;;  %v302_v7 = vpop.permute.xlu1 %301 }
  0xbe   :  { %v308_v29 = vadd.f32 %v302_v7, %v1330_v51 }
  0xc0   :  { %v310_v60 = vsub.f32 %v308_v29, %v298_v9 }
  0xc2   :  { %1104 = vrcp.f32 %v310_v60  ;;  %v462_v12 = vpop.permute.xlu1 %461 }
  0xc3   :  { %v468_v24 = vadd.f32 %v462_v12, %v1330_v51  ;;  %1106 = vrcp.f32 %v311_v43 }
  0xc5   :  { %v470_v35 = vsub.f32 %v468_v24, %v458_v23 }
  0xc6   :  { %v466_v38 = vpop.permute.xlu1 %465 }
  0xc7   :  { %v1103_v25 = vpop.eup %1102  ;;  %1108 = vrcp.f32 %v470_v35  ;;  %v469_v33 = vadd.f32 %v466_v38, %v1330_v51 }
  0xc8   :  { %v1362_v26 = vmul.f32 %v1103_v25, %v123_v47 }
  0xc9   :  { %v471_v30 = vsub.f32 %v469_v33, %v459_v4 }
  0xca   :  { %148 = vmax.xlane.f32.xlu1 %v1362_v26 }
  0xcb   :  { %1110 = vrcp.f32 %v471_v30 }
  0xcc   :  { %v1105_v41 = vpop.eup %1104 }
  0xcd   :  { %v1365_v42 = vmul.f32 %v1105_v41, %v298_v9  ;;  %v1107_v44 = vpop.eup %1106 }
  0xce   :  { %v1368_v46 = vmul.f32 %v1107_v44, %v299_v62 }
  0xcf   :  { %316 = vmax.xlane.f32.xlu0 %v1365_v42 }
  0xd1   :  { %v1109_v45 = vpop.eup %1108 }
  0xd2   :  { %v1370_v48 = vmul.f32 %v1109_v45, %v458_v23 }
  0xd3   :  { %318 = vmax.xlane.f32.xlu0 %v1368_v46 }
  0xd4   :  { %476 = vmax.xlane.f32.xlu1 %v1370_v48 }
  0xd5   :  { %v1111_v51 = vpop.eup %1110 }
  0xd6   :  { %v1374_v28 = vmul.f32 %v1111_v51, %v459_v4 }
  0xd8   :  { %2003 = vst [vmem:[#allocation2_spill] sm:$0xff] %v1374_v28 }
  0xe5   :  { %361 = vperm.xlu1 %1088, %v1260_v13  }
  0xe9   :  { %365 = vperm.xlu0 %1083, %v1267_v14   ;;  %371 = vperm.xlu1 %1088, %v947_v49  }
  0xed   :  { %375 = vperm.xlu1 %1088, %v1273_v15   ;;  %1089 = vset.pattern.permute.xlu0 %v1189_v1 }
  0xf1   :  { %1090 = vset.pattern.permute.xlu1 %v1189_v1 }
  0xf2   :  { %240 = vperm.xlu1 %1090, %v953_v50  }
  0xf6   :  { %245 = vperm.xlu1 %1090, %v1390_v52  }
  0xfa   :  { %1091 = vset.pattern.permute.xlu1 %v1188_v0 }
  0xfb   :  { %521 = vperm.xlu1 %1091, %v1260_v13   ;;  %v1407_v13 = vld [vmem:[%s1980_s0 + $0x80] sm:$0xff] }
  0xff   :  { %525 = vperm.xlu1 %1091, %v1267_v14   ;;  %v1412_v14 = vpop.permute.xlu1 %192 }
 0x103   :  { %531 = vperm.xlu1 %1091, %v947_v49   ;;  %v1421_v34 = vpop.permute.xlu1 %197 }
 0x107   :  { %535 = vperm.xlu1 %1091, %v1273_v15   ;;  %v1415_v15 = vand.u32 127, %v17_v18 }
 0x108   :  { %478 = vmax.xlane.f32.xlu0 %v1374_v28 }
 0x10b   :  { %1092 = vset.pattern.permute.xlu1 %v1190_v10 }
 0x10c   :  { %401 = vperm.xlu1 %1092, %v953_v50  }
 0x110   :  { %405 = vperm.xlu1 %1092, %v1390_v52  }
 0x114   :  { %1093 = vset.pattern.permute.xlu1 %v1188_v0 }
 0x115   :  { %561 = vperm.xlu1 %1093, %v953_v50  }
 0x119   :  { %1094 = vset.pattern.permute.xlu1 %v1190_v10 }
 0x11a   :  { %381 = vperm.xlu1 %1094, %v1279_v16  }
 0x11e   :  { %385 = vperm.xlu1 %1094, %v1285_v17   ;;  %204 = vperm.xlu0 %1089, %v947_v49  }
 0x122   :  { %228 = vperm.xlu0 %1089, %v1407_v13   ;;  %1096 = vset.pattern.permute.xlu1 %v1189_v1  ;;  %v1427_v1 = vpop.permute.xlu1 %209 }
 0x126   :  { %1095 = vset.pattern.permute.xlu0 %v1188_v0  ;;  %v1429_v39 = vpop.permute.xlu1 %216 }
 0x12a   :  { %v1431_v18 = vpop.permute.xlu1 %221 }
 0x13f   :  { %v147_v54 = vpop.xlane.xlu0 %146 }
 0x140   :  { %vm150_vm0 = vcmp.eq.f32.partialorder %v1340_v31, %v147_v54 }
 0x141   :  { %v1419_v55 = vsel %vm150_vm0, %v1415_v15, 128 }
 0x142   :  { %v155_v56 = vshra.s32 %v1419_v55, 16  ;;  %v154_v45 = vand.u32 65535, %v1419_v55 }
 0x144   :  { %v1424_v57 = vcvt.s32.f32 %v155_v56  ;;  %v156_v49 = vcvt.s32.f32 %v154_v45 }
 0x146   :  { %158 = vmin.xlane.f32.xlu1 %v1424_v57 }
 0x157   :  { %v149_v58 = vpop.xlane.xlu1 %148 }
 0x158   :  { %vm151_vm1 = vcmp.eq.f32.partialorder %v1362_v26, %v149_v58 }
 0x159   :  { %v1435_v53 = vsel %vm151_vm1, %v1415_v15, 128 }
 0x15a   :  { %v169_v59 = vshra.s32 %v1435_v53, 16 }
 0x15c   :  { %v317_v61 = vpop.xlane.xlu0 %316  ;;  %v1438_v47 = vcvt.s32.f32 %v169_v59 }
 0x15d   :  { %vm320_vm2 = vcmp.eq.f32.partialorder %v1365_v42, %v317_v61 }
 0x15e   :  { %v1442_v63 = vsel %vm320_vm2, %v1415_v15, 128  ;;  %172 = vmin.xlane.f32.xlu1 %v1438_v47 }
 0x15f   :  { %v325_v2 = vshra.s32 %v1442_v63, 16  ;;  %v324_v59 = vand.u32 65535, %v1442_v63 }
 0x160   :  { %v319_v3 = vpop.xlane.xlu0 %318 }
 0x161   :  { %vm321_vm3 = vcmp.eq.f32.partialorder %v1368_v46, %v319_v3  ;;  %v477_v4 = vpop.xlane.xlu1 %476  ;;  %v327_v27 = vcvt.s32.f32 %v325_v2  ;;  %v326_v2 = vcvt.s32.f32 %v324_v59 }
 0x162   :  { %v1448_v40 = vsel %vm321_vm3, %v1415_v15, 128  ;;  %vm480_vm4 = vcmp.eq.f32.partialorder %v1370_v48, %v477_v4 }
 0x163   :  { %v1452_v6 = vsel %vm480_vm4, %v1415_v15, 128  ;;  %328 = vmin.xlane.f32.xlu0 %v327_v27  ;;  %v339_v36 = vshra.s32 %v1448_v40, 16 }
 0x164   :  { %v485_v5 = vshra.s32 %v1452_v6, 16  ;;  %v484_v3 = vand.u32 65535, %v1452_v6 }
 0x165   :  { %v341_v62 = vcvt.s32.f32 %v339_v36  ;;  %v1470_v9 = vpop.permute.xlu1 %361 }
 0x166   :  { %v1456_v7 = vcvt.s32.f32 %v485_v5  ;;  %v486_v5 = vcvt.s32.f32 %v484_v3 }
 0x167   :  { %342 = vmin.xlane.f32.xlu0 %v341_v62 }
 0x168   :  { %v1477_v43 = vpop.permute.xlu0 %365 }
 0x169   :  { %v1473_v29 = vpop.permute.xlu1 %371 }
 0x16b   :  { %488 = vmin.xlane.f32.xlu0 %v1456_v7 }
 0x16d   :  { %v1475_v22 = vpop.permute.xlu1 %375 }
 0x16f   :  { %233 = vperm.xlu1 %1096, %v1462_v8  }
 0x171   :  { %v1479_v60 = vpop.permute.xlu1 %240 }
 0x173   :  { %1097 = vset.pattern.permute.xlu1 %v1188_v0 }
 0x174   :  { %541 = vperm.xlu1 %1097, %v1279_v16  }
 0x175   :  { %v1483_v16 = vpop.permute.xlu1 %245 }
 0x178   :  { %1098 = vset.pattern.permute.xlu1 %v1190_v10 }
 0x179   :  { %391 = vperm.xlu1 %1098, %v1407_v13  }
 0x17a   :  { %v1485_v24 = vpop.permute.xlu1 %521 }
 0x17d   :  { %395 = vperm.xlu1 %1098, %v1462_v8  }
 0x181   :  { %1099 = vset.pattern.permute.xlu1 %v1188_v0  ;;  %v1487_v0 = vpop.permute.xlu1 %525 }
 0x182   :  { %2004 = vst [vmem:[#allocation3_spill] sm:$0xff] %v1487_v0 }
 0x185   :  { %v1489_v35 = vpop.permute.xlu1 %531 }
 0x189   :  { %v1491_v38 = vpop.permute.xlu1 %535 }
 0x18a   :  { %2005 = vst [vmem:[#allocation4_spill] sm:$0xff] %v1491_v38 }
 0x18d   :  { %v1494_v25 = vpop.permute.xlu1 %401 }
 0x191   :  { %v1497_v33 = vpop.permute.xlu1 %405 }
 0x195   :  { %v479_v11 = vpop.xlane.xlu0 %478  ;;  %v1499_v30 = vpop.permute.xlu1 %561 }
 0x196   :  { %vm481_vm5 = vcmp.eq.f32.partialorder %v1374_v28, %v479_v11 }
 0x197   :  { %v483_v10 = vsel %vm481_vm5, %v1415_v15, 128 }
 0x198   :  { %v499_v12 = vshra.s32 %v483_v10, 16 }
 0x199   :  { %v1501_v41 = vpop.permute.xlu1 %381 }
 0x19a   :  { %v501_v23 = vcvt.s32.f32 %v499_v12 }
 0x19c   :  { %502 = vmin.xlane.f32.xlu0 %v501_v23 }
 0x19d   :  { %v1503_v44 = vpop.permute.xlu1 %385 }
 0x1b2   :  { %565 = vperm.xlu0 %1095, %v1390_v52   ;;  %v1510_v52 = vpop.permute.xlu0 %204 }
 0x1b6   :  { %545 = vperm.xlu0 %1095, %v1285_v17   ;;  %v168_v17 = vand.u32 65535, %v1435_v53  ;;  %v1513_v54 = vpop.permute.xlu0 %228 }
 0x1b8   :  { %v170_v58 = vcvt.s32.f32 %v168_v17 }
 0x1d3   :  { %v1506_v51 = vpop.xlane.xlu1 %158 }
 0x1d4   :  { %vm160_vm6 = vcmp.eq.f32.partialorder %v1424_v57, %v1506_v51  ;;  %v338_v57 = vand.u32 65535, %v1448_v40 }
 0x1d5   :  { %v161_v50 = vsel %vm160_vm6, %v156_v49, inf  ;;  %v1028_v49 = vld [vmem:[%s1982_s2 + $0x18] sm:$0xff]  }
 0x1d6   :  { %162 = vmin.xlane.f32.xlu0 %v161_v50  ;;  %v340_v36 = vcvt.s32.f32 %v338_v57  ;;  %v1558_v17 = vunpack.c.l.bf16 %v1028_v49  ;;  %v1030_v57 = vld [vmem:[%s1982_s2 + $0x28] sm:$0xff]  }
 0x1d8   :  { %2010 = vst [vmem:[#allocation9_spill] sm:$0xff] %v1558_v17 }
 0x1eb   :  { %v1515_v56 = vpop.xlane.xlu1 %172 }
 0x1ec   :  { %vm174_vm7 = vcmp.eq.f32.partialorder %v1438_v47, %v1515_v56 }
 0x1ed   :  { %v175_v55 = vsel %vm174_vm7, %v170_v58, inf  ;;  %v1029_v58 = vld [vmem:[%s1982_s2 + $0x20] sm:$0xff]  }
 0x1ee   :  { %176 = vmin.xlane.f32.xlu0 %v175_v55  ;;  %v1564_v55 = vunpack.c.l.bf16 %v1029_v58  ;;  %v1601_v32 = vunpack.c.h.bf16 %v1029_v58 }
 0x1ef   :  { %v1603_v20 = vpop.permute.xlu1 %233 }
 0x1f0   :  { %v1521_v61 = vpop.xlane.xlu0 %328  ;;  %2011 = vst [vmem:[#allocation10_spill] sm:$0xff] %v1564_v55  ;;  %2015 = vst [vmem:[#allocation14_spill] sm:$0xff] %v1601_v32 }
 0x1f1   :  { %vm330_vm8 = vcmp.eq.f32.partialorder %v327_v27, %v1521_v61  ;;  %v498_v27 = vand.u32 65535, %v483_v10  ;;  %v1027_v10 = vld [vmem:[%s1982_s2 + $0x10] sm:$0xff]  }
 0x1f2   :  { %v331_v53 = vsel %vm330_vm8, %v326_v2, inf }
 0x1f3   :  { %332 = vmin.xlane.f32.xlu1 %v331_v53  ;;  %v500_v6 = vcvt.s32.f32 %v498_v27  ;;  %v1570_v53 = vunpack.c.l.bf16 %v1030_v57 }
 0x1f4   :  { %v1525_v4 = vpop.xlane.xlu0 %342 }
 0x1f5   :  { %vm344_vm9 = vcmp.eq.f32.partialorder %v341_v62, %v1525_v4  ;;  %v992_v62 = vld [vmem:[%s1982_s2] sm:$0xff]  }
 0x1f6   :  { %v345_v63 = vsel %vm344_vm9, %v340_v36, inf  ;;  %v1543_v45 = vunpack.c.l.bf16 %v992_v62  ;;  %v1572_v3 = vunpack.c.h.bf16 %v992_v62 }
 0x1f7   :  { %346 = vmin.xlane.f32.xlu0 %v345_v63  ;;  %v1031_v63 = vld [vmem:[%s1982_s2 + $0x30] sm:$0xff]  }
 0x1f8   :  { %v1528_v47 = vpop.xlane.xlu0 %488  ;;  %2007 = vst [vmem:[#allocation6_spill] sm:$0xff] %v1543_v45  ;;  %2012 = vst [vmem:[#allocation11_spill] sm:$0xff] %v1572_v3 }
 0x1f9   :  { %vm490_vm10 = vcmp.eq.f32.partialorder %v1456_v7, %v1528_v47  ;;  %v1026_v7 = vld [vmem:[%s1982_s2 + $0x8] sm:$0xff]  }
 0x1fa   :  { %v491_v40 = vsel %vm490_vm10, %v486_v5, inf  ;;  %v1574_v36 = vunpack.c.h.bf16 %v1026_v7 }
 0x1fb   :  { %492 = vmin.xlane.f32.xlu1 %v491_v40  ;;  %v1580_v40 = vunpack.c.l.bf16 %v1031_v63 }
 0x1fc   :  { %2013 = vst [vmem:[#allocation12_spill] sm:$0xff] %v1574_v36  ;;  %v675_v27 = vmax.f32 %v1572_v3, %v1574_v36 }
 0x20d   :  { %551 = vperm.xlu0 %1095, %v1407_v13   ;;  %v1545_v13 = vunpack.c.l.bf16 %v1026_v7 }
 0x20f   :  { %2008 = vst [vmem:[#allocation7_spill] sm:$0xff] %v1545_v13 }
 0x229   :  { %v1533_v11 = vpop.xlane.xlu0 %502 }
 0x22a   :  { %2006 = vst [vmem:[#allocation5_spill] sm:$0xff] %v1533_v11  ;;  %vm504_vm11 = vcmp.eq.f32.partialorder %v501_v23, %v1533_v11  ;;  %v674_v23 = vmax.f32 %v1543_v45, %v1545_v13 }
 0x22b   :  { %v505_v12 = vsel %vm504_vm11, %v500_v6, inf  ;;  %v1584_v6 = vunpack.c.h.bf16 %v1027_v10 }
 0x22c   :  { %506 = vmin.xlane.f32.xlu1 %v505_v12  ;;  %v1032_v12 = vld [vmem:[%s1982_s2 + $0x38] sm:$0xff]  }
 0x22d   :  { %v1590_v7 = vunpack.c.l.bf16 %v1032_v12 }
 0x23d   :  { %555 = vperm.xlu1 %1099, %v1462_v8   ;;  %v1552_v8 = vunpack.c.l.bf16 %v1027_v10 }
 0x23f   :  { %2009 = vst [vmem:[#allocation8_spill] sm:$0xff] %v1552_v8  ;;  %v681_v50 = vmax.f32 %v674_v23, %v1552_v8  ;;  %v682_v23 = vmax.f32 %v675_v27, %v1584_v6 }
 0x241   :  { %v688_v59 = vmax.f32 %v681_v50, %v1558_v17  ;;  %v1593_v50 = vunpack.c.h.bf16 %v1028_v49  ;;  %v1610_v49 = vunpack.c.h.bf16 %v1030_v57 }
 0x243   :  { %v695_v2 = vmax.f32 %v688_v59, %v1564_v55  ;;  %v1595_v59 = vpop.permute.xlu0 %565  ;;  %v689_v10 = vmax.f32 %v682_v23, %v1593_v50  ;;  %2017 = vst [vmem:[#allocation16_spill] sm:$0xff] %v1610_v49  ;;  %v1617_v23 = vunpack.c.h.bf16 %v1031_v63 }
 0x244   :  { %2014 = vst [vmem:[#allocation13_spill] sm:$0xff] %v1595_v59 }
 0x245   :  { %v702_v5 = vmax.f32 %v695_v2, %v1570_v53  ;;  %v696_v27 = vmax.f32 %v689_v10, %v1601_v32  ;;  %2018 = vst [vmem:[#allocation17_spill] sm:$0xff] %v1617_v23  ;;  %v1621_v10 = vunpack.c.h.bf16 %v1032_v12 }
 0x247   :  { %v709_v62 = vmax.f32 %v702_v5, %v1580_v40  ;;  %v1605_v37 = vpop.permute.xlu0 %545  ;;  %v703_v58 = vmax.f32 %v696_v27, %v1610_v49  ;;  %v335_v27 = vcvt.f32.s32 %v1521_v61 }
 0x248   :  { %2016 = vst [vmem:[#allocation15_spill] sm:$0xff] %v1605_v37  ;;  %v165_v37 = vcvt.f32.s32 %v1506_v51 }
 0x249   :  { %v1598_v2 = vmax.f32 %v709_v62, %v1590_v7  ;;  %v1614_v62 = vpop.permute.xlu1 %541  ;;  %v710_v11 = vmax.f32 %v703_v58, %v1617_v23 }
 0x24b   :  { %v718_v5 = vsub.f32 %v1543_v45, %v1598_v2  ;;  %v730_v38 = vsub.f32 %v1545_v13, %v1598_v2  ;;  %v166_v13 = vshll.u32 %v165_v37, 16  ;;  %v754_v63 = vsub.f32 %v1558_v17, %v1598_v2 }
 0x24c   :  { %v1633_v51 = vmax.f32 %v710_v11, %v1621_v10  ;;  %v495_v17 = vcvt.f32.s32 %v1528_v47 }
 0x24d   :  { %v720_v0 = vmul.f32 1.442695, %v718_v5  ;;  %v732_v59 = vmul.f32 1.442695, %v730_v38  ;;  %v1623_v45 = vpop.permute.xlu1 %391  ;;  %v742_v5 = vsub.f32 %v1552_v8, %v1598_v2  ;;  %v179_v38 = vcvt.f32.s32 %v1515_v56 }
 0x24e   :  { %v756_v37 = vmul.f32 1.442695, %v754_v63  ;;  %v731_v61 = vsub.f32 %v1574_v36, %v1633_v51 }
 0x24f   :  { %1112 = vpow2.f32 %v720_v0  ;;  %v766_v0 = vsub.f32 %v1564_v55, %v1598_v2  ;;  %v180_v8 = vshll.u32 %v179_v38, 16  ;;  %v719_v55 = vsub.f32 %v1572_v3, %v1633_v51 }
 0x250   :  { %1114 = vpow2.f32 %v732_v59  ;;  %v349_v59 = vcvt.f32.s32 %v1525_v4  ;;  %v496_v38 = vshll.u32 %v495_v17, 16 }
 0x251   :  { %v1637_v58 = vpop.permute.xlu1 %395  ;;  %v768_v56 = vmul.f32 1.442695, %v766_v0 }
 0x252   :  { %v350_v63 = vshll.u32 %v349_v59, 16 }
 0x259   :  { %v1113_v4 = vpop.eup %1112 }
 0x263   :  { %v163_v28 = vpop.xlane.xlu0 %162 }
 0x264   :  { %v164_v57 = vcvt.f32.s32 %v163_v28  ;;  %v744_v28 = vmul.f32 1.442695, %v742_v5  ;;  %v336_v5 = vshll.u32 %v335_v27, 16  ;;  %v743_v27 = vsub.f32 %v1584_v6, %v1633_v51 }
 0x266   :  { %v167_v12 = vadd.s32 %v166_v13, %v164_v57  ;;  %v778_v13 = vsub.f32 %v1570_v53, %v1598_v2  ;;  %1116 = vpow2.f32 %v744_v28  ;;  %v1115_v57 = vpop.eup %1114  ;;  %v734_v28 = vmul.f32 1.442695, %v731_v61 }
 0x267   :  { %1118 = vpow2.f32 %v756_v37  ;;  %v1657_v59 = vadd.f32 %v1115_v57, %v1113_v4  ;;  %v596_v4 = vsub.s32 6, %v1290_v19 }
 0x268   :  { %vm182_vm12 = vcmp.eq.s32.totalorder %v1415_v15, %v167_v12  ;;  %1120 = vpow2.f32 %v768_v56  ;;  %v722_v12 = vmul.f32 1.442695, %v719_v55  ;;  %v1652_v36 = vmul.f32 1.442695, %v778_v13 }
 0x269   :  { %v184_v0 = vsel %vm182_vm12, 2.0, %v1340_v31  ;;  %v2019_v55 = vsub.s32 1, %v1290_v19  ;;  %v2020_v56 = vsub.s32 2, %v1290_v19  ;;  %v584_v13 = vsub.s32 5, %v1290_v19 }
 0x26a   :  { %vm186_vm14 = vcmp.gt.f32.partialorder %v184_v0, -1.0  ;;  %1122 = vpow2.f32 %v722_v12 }
 0x26b   :  { %1124 = vpow2.f32 %v734_v28  ;;  %v200_v31 = vsel %vm186_vm14, %v1412_v14, 0.0  ;;  %v248_v28 = vsel %vm186_vm14, %v1479_v60, 0.0  ;;  %v1772_v14 = vrot.slane %v1296_v21, %v584_v13 }
 0x27b   :  { %v177_v23 = vpop.xlane.xlu0 %176 }
 0x27c   :  { %v178_v11 = vcvt.f32.s32 %v177_v23  ;;  %v20_v23 = vld [vmem:[%s1981_s3 + $0x8] sm:$0x7] }
 0x27d   :  { %v1663_v37 = vrot.slane %v20_v23, %v2019_v55  ;;  %v755_v55 = vsub.f32 %v1593_v50, %v1633_v51 }
 0x27e   :  { %v181_v47 = vadd.s32 %v180_v8, %v178_v11  ;;  %v1667_v11 = vrot.slane %v20_v23, %v2020_v56  ;;  %v188_v56 = vsel %vm186_vm14, %v184_v0, -1.0 }
 0x280   :  { %vm183_vm13 = vcmp.eq.s32.totalorder %v1415_v15, %v181_v47  ;;  %v333_v3 = vpop.xlane.xlu1 %332  ;;  %v746_v47 = vmul.f32 1.442695, %v743_v27  ;;  %v236_v27 = vsel %vm186_vm14, %v1513_v54, 0.0 }
 0x281   :  { %v185_v8 = vsel %vm183_vm13, 2.0, %v1362_v26  ;;  %v334_v17 = vcvt.f32.s32 %v333_v3  ;;  %v2021_v26 = vsub.s32 0, %v1290_v19 }
 0x282   :  { %vm187_vm15 = vcmp.gt.f32.partialorder %v185_v8, -1.0  ;;  %1126 = vpow2.f32 %v746_v47  ;;  %v1794_v47 = vld [vmem:[%s1983_s1 + $0x8] sm:$0xff]  }
 0x283   :  { %v337_v61 = vadd.s32 %v336_v5, %v334_v17  ;;  %v1672_v3 = vrot.slane %v20_v23, %v2021_v26  ;;  %v212_v23 = vsel %vm186_vm14, %v1510_v52, 0.0  ;;  %v1688_v17 = vpop.eup %1116  ;;  %v189_v26 = vsel %vm187_vm15, %v185_v8, -1.0 }
 0x284   :  { %v347_v57 = vpop.xlane.xlu0 %346  ;;  %v224_v52 = vsel %vm186_vm14, %v1429_v39, 0.0  ;;  %v590_v8 = vsub.s32 7, %v1290_v19  ;;  %v767_v19 = vsub.f32 %v1601_v32, %v1633_v51 }
 0x285   :  { %vm352_vm0 = vcmp.eq.s32.totalorder %v1415_v15, %v337_v61  ;;  %v348_v5 = vcvt.f32.s32 %v347_v57  ;;  %v1697_v57 = vpop.eup %1118 }
 0x286   :  { %v354_v12 = vsel %vm352_vm0, 2.001, %v1365_v42  ;;  %v1710_v0 = vpop.eup %1120 }
 0x287   :  { %vm1691_vm1 = vcmp.gt.f32.partialorder %v354_v12, %v188_v56  ;;  %v351_v61 = vadd.s32 %v350_v63, %v348_v5 }
 0x288   :  { %v368_v42 = vsel %vm1691_vm1, %v1470_v9, %v200_v31  ;;  %v378_v60 = vsel %vm1691_vm1, %v1473_v29, %v212_v23  ;;  %v358_v54 = vsel %vm1691_vm1, %v354_v12, %v188_v56  ;;  %v408_v63 = vsel %vm1691_vm1, %v1494_v25, %v248_v28  ;;  %v493_v5 = vpop.xlane.xlu1 %492 }
 0x289   :  { %vm353_vm2 = vcmp.eq.s32.totalorder %v1415_v15, %v351_v61  ;;  %v494_v39 = vcvt.f32.s32 %v493_v5  ;;  %v398_v9 = vsel %vm1691_vm1, %v1623_v45, %v236_v27  ;;  %v388_v29 = vsel %vm1691_vm1, %v1501_v41, %v224_v52  ;;  %v2045_v45 = vld [vmem:[#allocation11_spill] sm:$0xff] }
 0x28a   :  { %v1721_v31 = vsel %vm187_vm15, %v1421_v34, 0.0  ;;  %v1725_v25 = vsel %vm187_vm15, %v1427_v1, 0.0  ;;  %v355_v56 = vsel %vm353_vm2, 2.001, %v1368_v46  ;;  %v1730_v23 = vsel %vm187_vm15, %v1483_v16, 0.0 }
 0x28b   :  { %vm1732_vm3 = vcmp.gt.f32.partialorder %v355_v56, %v189_v26  ;;  %v497_v12 = vadd.s32 %v496_v38, %v494_v39  ;;  %v1738_v41 = vsel %vm187_vm15, %v1603_v20, 0.0  ;;  %v1742_v34 = vsel %vm187_vm15, %v1431_v18, 0.0  ;;  %v1123_v18 = vpop.eup %1122  ;;  %v1782_v39 = vld [vmem:[%s1983_s1 + $0x10] sm:$0xff]  }
 0x28c   :  { %v1754_v16 = vsel %vm1732_vm3, %v355_v56, %v189_v26  ;;  %v1125_v27 = vpop.eup %1124  ;;  %v1775_v61 = vrot.slane %v1296_v21, %v596_v4  ;;  %v552_v52 = vpop.permute.xlu0 %551  ;;  %v758_v5 = vmul.f32 1.442695, %v755_v55  ;;  %v1789_v4 = vld [vmem:[%s1983_s1] sm:$0xff]  }
 0x28d   :  { %vm512_vm4 = vcmp.eq.s32.totalorder %v1415_v15, %v497_v12  ;;  %v737_v38 = vadd.f32 %v1125_v27, %v1123_v18 }
 0x28e   :  { %v514_v26 = vsel %vm512_vm4, 2.002, %v1370_v48  ;;  %1128 = vpow2.f32 %v758_v5 }
 0x28f   :  { %vm516_vm5 = vcmp.gt.f32.partialorder %v514_v26, %v358_v54  ;;  %1130 = vpow2.f32 %v1652_v36 }
 0x290   :  { %v518_v56 = vsel %vm516_vm5, %v514_v26, %v358_v54  ;;  %v568_v48 = vsel %vm516_vm5, %v1499_v30, %v408_v63  ;;  %v558_v13 = vsel %vm516_vm5, %v552_v52, %v398_v9  ;;  %v528_v12 = vsel %vm516_vm5, %v1485_v24, %v368_v42  ;;  %v1809_v26 = vld [vmem:[%s1983_s1 + $0x18] sm:$0xff]   ;;  %s1943_s1 = smov 0  }
 0x291   :  { %vm570_vm6 = vcmp.lt.f32.partialorder %v518_v56, 0.5  ;;  %v538_v55 = vsel %vm516_vm5, %v1489_v35, %v378_v60  ;;  %v548_v54 = vsel %vm516_vm5, %v1614_v62, %v388_v29  ;;  %v1799_v30 = vrot.slane %v1296_v21, %v590_v8 }
 0x292   :  { %v1801_v63 = vsel %vm570_vm6, 0.0, %v568_v48  ;;  %v586_v24 = vsub.f32 %v528_v12, %v1772_v14  ;;  %v598_v42 = vsub.f32 %v538_v55, %v1775_v61  ;;  %v985_v9 = vunpack.c.l.bf16 %v1782_v39 }
 0x293   :  { %vm574_vm7 = vcmp.ne.f32.partialorder %v1801_v63, 0.0  ;;  %v779_v35 = vsub.f32 %v1610_v49, %v1633_v51  ;;  %v977_v21 = vunpack.c.l.bf16 %v1789_v4  ;;  %v981_v62 = vunpack.c.l.bf16 %v1794_v47 }
 0x294   :  { %v1999_v60 = vmov 0.0   ;;  %v770_v8 = vmul.f32 1.442695, %v767_v19  ;;  %v610_v52 = vsub.f32 %v548_v54, %v1663_v37  ;;  %v748_v56 = vadd.f32 %v1688_v17, %v1657_v59  ;;  %v2027_v59 = vld [vmem:[#allocation17_spill] sm:$0xff] }
 0x295   :  { %v576_v29 = vsel %vm574_vm7, 1.0, %v1999_v60  ;;  %v2026_v48 = vsub.f32 %v1580_v40, %v1598_v2  ;;  %v802_v55 = vsub.f32 %v1590_v7, %v1598_v2  ;;  %v989_v28 = vunpack.c.l.bf16 %v1809_v26 }
 0x296   :  { %578 = vadd.xlane.f32.xlu0 %v576_v29  ;;  %v616_v5 = vsub.f32 %v558_v13, %v1667_v11  ;;  %v592_v19 = vmul.f32 %v1799_v30, %v586_v24  ;;  %v604_v54 = vmul.f32 %v1672_v3, %v598_v42  ;;  %v782_v29 = vmul.f32 1.442695, %v779_v35 }
 0x297   :  { %v792_v12 = vmul.f32 1.442695, %v2026_v48  ;;  %v791_v17 = vsub.f32 %v2027_v59, %v1633_v51  ;;  %1132 = vpow2.f32 %v770_v8  ;;  %v642_v1 = vsub.f32 %v985_v9, %v610_v52  ;;  %v1127_v48 = vpop.eup %1126 }
 0x298   :  { %v622_v36 = vsub.f32 %v977_v21, %v592_v19  ;;  %v631_v60 = vsub.f32 %v981_v62, %v604_v54  ;;  %v804_v46 = vmul.f32 1.442695, %v802_v55  ;;  %v653_v20 = vsub.f32 %v989_v28, %v616_v5  ;;  %v1129_v62 = vpop.eup %1128  ;;  %v2028_v5 = vld [vmem:[#allocation6_spill] sm:$0xff] }
 0x299   :  { %1134 = vpow2.f32 %v792_v12  ;;  %v760_v49 = vadd.f32 %v1697_v57, %v748_v56  ;;  %v794_v24 = vmul.f32 1.442695, %v791_v17  ;;  %v803_v42 = vsub.f32 %v1621_v10, %v1633_v51  ;;  %v1131_v18 = vpop.eup %1130 }
 0x29a   :  { %v624_v13 = vand.u32 2147483647, %v622_v36  ;;  %v633_v32 = vand.u32 2147483647, %v631_v60  ;;  %1136 = vpow2.f32 %v782_v29  ;;  %v644_v59 = vand.u32 2147483647, %v642_v1 }
 0x29b   :  { %1138 = vpow2.f32 %v804_v46  ;;  %v749_v21 = vadd.f32 %v1127_v48, %v737_v38  ;;  %v772_v9 = vadd.f32 %v1710_v0, %v760_v49  ;;  %v655_v52 = vand.u32 2147483647, %v653_v20  ;;  %v2030_v36 = vld [vmem:[#allocation8_spill] sm:$0xff] }
 0x29c   :  { %v635_v35 = vadd.f32 %v633_v32, %v624_v13  ;;  %1140 = vpow2.f32 %v794_v24  ;;  %v806_v28 = vmul.f32 1.442695, %v803_v42  ;;  %vm726_vm8 = vcmp.eq.f32.partialorder %v1801_v63, 0.0  ;;  %v2031_v24 = vld [vmem:[#allocation9_spill] sm:$0xff] }
 0x29d   :  { %v761_v27 = vadd.f32 %v1129_v62, %v749_v21  ;;  %v784_v56 = vadd.f32 %v1131_v18, %v772_v9  ;;  %v728_v19 = vsel %vm726_vm8, %v2028_v5, 0.0  ;;  %vm738_vm9 = vcmp.eq.f32.partialorder %v1801_v63, 1.0  ;;  %v2033_v62 = vld [vmem:[#allocation10_spill] sm:$0xff]  ;;  %v2036_v5 = vld [vmem:[#allocation13_spill] sm:$0xff] }
 0x29e   :  { %v646_v8 = vadd.f32 %v644_v59, %v635_v35  ;;  %1142 = vpow2.f32 %v806_v28  ;;  %v2029_v59 = vld [vmem:[#allocation7_spill] sm:$0xff]  ;;  %vm750_vm10 = vcmp.eq.f32.partialorder %v1801_v63, 2.0  ;;  %vm762_vm11 = vcmp.eq.f32.partialorder %v1801_v63, 3.0  ;;  %v2032_v35 = vld [vmem:[#allocation5_spill] sm:$0xff] }
 0x29f   :  { %v740_v17 = vsel %vm738_vm9, %v2029_v59, %v728_v19  ;;  %v509_v21 = vcvt.f32.s32 %v2032_v35  ;;  %vm774_vm12 = vcmp.eq.f32.partialorder %v1801_v63, 4.0  ;;  %vm786_vm13 = vcmp.eq.f32.partialorder %v1801_v63, 5.0 }
 0x2a0   :  { %v657_v57 = vadd.f32 %v655_v52, %v646_v8  ;;  %v752_v48 = vsel %vm750_vm10, %v2030_v36, %v740_v17  ;;  %vm798_vm14 = vcmp.eq.f32.partialorder %v1801_v63, 6.0  ;;  %vm810_vm0 = vcmp.eq.f32.partialorder %v1801_v63, 7.0 }
 0x2a1   :  { %v1133_v60 = vpop.eup %1132  ;;  %v764_v42 = vsel %vm762_vm11, %v2031_v24, %v752_v48  ;;  %v510_v18 = vshll.u32 %v509_v21, 16  ;;  %v978_v36 = vunpack.c.h.bf16 %v1789_v4 }
 0x2a2   :  { %v1840_v12 = vsel %vm574_vm7, %v657_v57, 0.0  ;;  %v773_v1 = vadd.f32 %v1133_v60, %v761_v27  ;;  %v776_v9 = vsel %vm774_vm12, %v2033_v62, %v764_v42 }
 0x2a3   :  { %v1135_v32 = vpop.eup %1134  ;;  %v788_v57 = vsel %vm786_vm13, %v1570_v53, %v776_v9  ;;  %v990_v53 = vunpack.c.h.bf16 %v1809_v26 }
 0x2a4   :  { %v1137_v46 = vpop.eup %1136  ;;  %v796_v38 = vadd.f32 %v1135_v32, %v784_v56  ;;  %v800_v56 = vsel %vm798_vm14, %v1580_v40, %v788_v57 }
 0x2a5   :  { %v1139_v55 = vpop.eup %1138  ;;  %v785_v49 = vadd.f32 %v1137_v46, %v773_v1  ;;  %v2034_v1 = vld [vmem:[#allocation2_spill] sm:$0xff] }
 0x2a6   :  { %v1141_v0 = vpop.eup %1140  ;;  %v808_v20 = vadd.f32 %v1139_v55, %v796_v38 }
 0x2a7   :  { %v797_v54 = vadd.f32 %v1141_v0, %v785_v49  ;;  %v812_v49 = vsel %vm810_vm0, %v1590_v7, %v800_v56  ;;  %v986_v0 = vunpack.c.h.bf16 %v1782_v39  ;;  %v2038_v7 = vsel %vm1732_vm3, %v1477_v43, %v1721_v31  ;;  %v2039_v39 = vld [vmem:[#allocation3_spill] sm:$0xff] }
 0x2a8   :  { %v1143_v29 = vpop.eup %1142  ;;  %1144 = vlog2.f32 %v808_v20  ;;  %v2035_v20 = vsel %vm1732_vm3, %v1497_v33, %v1730_v23  ;;  %v2040_v33 = vsel %vm1732_vm3, %v1475_v22, %v1725_v25  ;;  %v2041_v23 = vld [vmem:[#allocation4_spill] sm:$0xff]  ;;  %v2044_v22 = vmov 0.0  }
 0x2a9   :  { %v809_v13 = vadd.f32 %v1143_v29, %v797_v54 }
 0x2ab   :  { %1146 = vlog2.f32 %v809_v13 }
 0x2b2   :  { %v1145_v8 = vpop.eup %1144 }
 0x2b3   :  { %v815_v27 = vmul.f32 0.6931472, %v1145_v8 }
 0x2b5   :  { %v1147_v46 = vpop.eup %1146  ;;  %v818_v55 = vadd.f32 %v815_v27, %v1598_v2  ;;  %v2037_v2 = vsel %vm1732_vm3, %v1637_v58, %v1738_v41  ;;  %v2042_v58 = vsel %vm1732_vm3, %v1503_v44, %v1742_v34  ;;  %v2043_v41 = vld [vmem:[#allocation15_spill] sm:$0xff]  ;;  %v982_v34 = vunpack.c.h.bf16 %v1794_v47 }
 0x2b6   :  { %v817_v26 = vmul.f32 0.6931472, %v1147_v46 }
 0x2b7   :  { %v820_v48 = vsub.f32 %v818_v55, %v812_v49 }
 0x2b8   :  { %v819_v4 = vadd.f32 %v817_v26, %v1633_v51 }
 0x2b9   :  { %v507_v52 = vpop.xlane.xlu1 %506 }
 0x2ba   :  { %v508_v28 = vcvt.f32.s32 %v507_v52 }
 0x2bc   :  { %v511_v60 = vadd.s32 %v510_v18, %v508_v28 }
 0x2bd   :  { %v556_v32 = vpop.permute.xlu1 %555 }
 0x2be   :  { %vm513_vm15 = vcmp.eq.s32.totalorder %v1415_v15, %v511_v60 }
 0x2bf   :  { %v515_v38 = vsel %vm513_vm15, 2.002, %v2034_v1 }
 0x2c0   :  { %vm517_vm1 = vcmp.gt.f32.partialorder %v515_v38, %v1754_v16 }
 0x2c1   :  { %v519_v40 = vsel %vm517_vm1, %v515_v38, %v1754_v16  ;;  %v569_v19 = vsel %vm517_vm1, %v2036_v5, %v2035_v20  ;;  %v559_v54 = vsel %vm517_vm1, %v556_v32, %v2037_v2  ;;  %v529_v16 = vsel %vm517_vm1, %v2039_v39, %v2038_v7 }
 0x2c2   :  { %vm571_vm2 = vcmp.lt.f32.partialorder %v519_v40, 0.5  ;;  %v539_v29 = vsel %vm517_vm1, %v2041_v23, %v2040_v33  ;;  %v549_v59 = vsel %vm517_vm1, %v2043_v41, %v2042_v58  ;;  %v587_v43 = vsub.f32 %v529_v16, %v1772_v14  ;;  %v2046_v14 = vld [vmem:[#allocation12_spill] sm:$0xff] }
 0x2c3   :  { %v573_v17 = vsel %vm571_vm2, 0.0, %v569_v19  ;;  %v599_v31 = vsub.f32 %v539_v29, %v1775_v61  ;;  %v611_v44 = vsub.f32 %v549_v59, %v1663_v37  ;;  %v617_v24 = vsub.f32 %v559_v54, %v1667_v11  ;;  %v2047_v11 = vld [vmem:[#allocation14_spill] sm:$0xff] }
 0x2c4   :  { %vm575_vm4 = vcmp.ne.f32.partialorder %v573_v17, 0.0  ;;  %vm727_vm5 = vcmp.eq.f32.partialorder %v573_v17, 0.0  ;;  %vm739_vm6 = vcmp.eq.f32.partialorder %v573_v17, 1.0  ;;  %vm751_vm3 = vcmp.eq.f32.partialorder %v573_v17, 2.0 }
 0x2c5   :  { %v577_v25 = vsel %vm575_vm4, 1.0, %v2044_v22  ;;  %v729_v13 = vsel %vm727_vm5, %v2045_v45, 0.0  ;;  %vm763_vm8 = vcmp.eq.f32.partialorder %v573_v17, 3.0  ;;  %v593_v35 = vmul.f32 %v1799_v30, %v587_v43  ;;  %v2049_v30 = vld [vmem:[#allocation17_spill] sm:$0xff] }
 0x2c6   :  { %580 = vadd.xlane.f32.xlu1 %v577_v25  ;;  %v741_v61 = vsel %vm739_vm6, %v2046_v14, %v729_v13  ;;  %v605_v21 = vmul.f32 %v1672_v3, %v599_v31  ;;  %v822_v37 = vsel %vm574_vm7, %v820_v48, 0.0  ;;  %vm775_vm9 = vcmp.eq.f32.partialorder %v573_v17, 4.0 }
 0x2c7   :  { %v753_v42 = vsel %vm751_vm3, %v1584_v6, %v741_v61  ;;  %vm787_vm10 = vcmp.eq.f32.partialorder %v573_v17, 5.0  ;;  %v623_v9 = vsub.f32 %v978_v36, %v593_v35  ;;  %v643_v52 = vsub.f32 %v986_v0, %v611_v44  ;;  %v2048_v6 = vld [vmem:[#allocation16_spill] sm:$0xff] }
 0x2c8   :  { %v765_v47 = vsel %vm763_vm8, %v1593_v50, %v753_v42  ;;  %v632_v8 = vsub.f32 %v982_v34, %v605_v21  ;;  %v654_v51 = vsub.f32 %v990_v53, %v617_v24  ;;  %vm799_vm11 = vcmp.eq.f32.partialorder %v573_v17, 6.0 }
 0x2c9   :  { %v777_v62 = vsel %vm775_vm9, %v2047_v11, %v765_v47  ;;  %vm811_vm12 = vcmp.eq.f32.partialorder %v573_v17, 7.0  ;;  %v625_v3 = vand.u32 2147483647, %v623_v9  ;;  %v1918_v50 = vsel %vm574_vm7, 0.0, %v820_v48 }
 0x2ca   :  { %824 = vadd.xlane.f32.xlu1 %v822_v37  ;;  %v789_v18 = vsel %vm787_vm10, %v2048_v6, %v777_v62  ;;  %v634_v57 = vand.u32 2147483647, %v632_v8  ;;  %v645_v32 = vand.u32 2147483647, %v643_v52  ;;  %v656_v38 = vand.u32 2147483647, %v654_v51 }
 0x2cb   :  { %v801_v28 = vsel %vm799_vm11, %v2049_v30, %v789_v18  ;;  %v1176_v33 = vmov 0.0   ;;  %v1180_v23 = vmov 0.0  }
 0x2cc   :  { %v813_v27 = vsel %vm811_vm12, %v1621_v10, %v801_v28  ;;  %v636_v56 = vadd.f32 %v634_v57, %v625_v3 }
 0x2cd   :  { %v821_v60 = vsub.f32 %v819_v4, %v813_v27 }
 0x2ce   :  { %834 = vmax.xlane.f32.xlu1 %v1918_v50  ;;  %v647_v1 = vadd.f32 %v645_v32, %v636_v56 }
 0x2cf   :  { %v823_v46 = vsel %vm575_vm4, %v821_v60, 0.0  ;;  %v829_v10 = vsel %vm575_vm4, 0.0, %v821_v60 }
 0x2d0   :  { %826 = vadd.xlane.f32.xlu0 %v823_v46  ;;  %v658_v55 = vadd.f32 %v656_v38, %v647_v1 }
 0x2d2   :  { %v660_v53 = vsel %vm575_vm4, %v658_v55, 0.0 }
 0x2d4   :  { %661 = vadd.xlane.f32.xlu0 %v1840_v12 }
 0x2d8   :  { %663 = vadd.xlane.f32.xlu0 %v660_v53 }
 0x2dc   :  { %836 = vmax.xlane.f32.xlu0 %v829_v10 }
 0x323   :  { %v1925_v63 = vpop.xlane.xlu0 %578 }
 0x324   :  { %v1928_v49 = vmul.f32 3.0, %v1925_v63 }
 0x326   :  { %v832_v0 = vmin.f32 %v1928_v49, 128.0 }
 0x353   :  { %v1931_v40 = vpop.xlane.xlu1 %580 }
 0x354   :  { %v1934_v20 = vmul.f32 3.0, %v1931_v40 }
 0x356   :  { %v833_v5 = vmin.f32 %v1934_v20, 128.0 }
 0x357   :  { %v1937_v19 = vpop.xlane.xlu1 %824 }
 0x35b   :  { %v835_v12 = vpop.xlane.xlu1 %834  }
 0x35c   :  { %v1172_v26 = vmov %v835_v12  }
 0x35d   :  { %v1939_v2 = vpop.xlane.xlu0 %826 }
 0x361   :  { %v662_v54 = vpop.xlane.xlu0 %661 }
 0x365   :  { %v1941_v7 = vpop.xlane.xlu0 %663 }
 0x369   :  { %v837_v39 = vpop.xlane.xlu0 %836  }
 0x36a   :  { %v1168_v16 = vmov %v837_v39  }
 0x36b LB: > { %v848_v29 = vadd.f32 %v1174_v26, %v1182_v23  ;;  %v849_v58 = vadd.f32 %v1170_v16, %v1178_v33  ;;  %v1192_v17 = vmov 0.0   ;;  %s843_s1 = sadd.s32 1, %s1186_s1   ;;  %s1186_s1 = sphi %s1943_s1, %s843_s1   ;;  %v1182_v23 = vphi %v1180_v23, %v862_v23   ;;  %v1178_v33 = vphi %v1176_v33, %v863_v33   ;;  %v1174_v26 = vphi %v1172_v26, %v1173_v26   ;;  %v1170_v16 = vphi %v1168_v16, %v1169_v16  }
 0x36c   : > { %p840_p0 = scmp.ge.s32.totalorder %s843_s1, 24  }
 0x36d   : > { %v850_v41 = vmul.f32 0.5, %v848_v29  ;;  %v851_v59 = vmul.f32 0.5, %v849_v58  ;;  %v2050_v45 = vmov (%p840_p0), 0.0   ;;  %vm888_vm2 = vcmp.eq.s32.totalorder (%p840_p0), %v1415_v15, 0 }
 0x36e   :  { %vm893_vm4 = vcmp.eq.s32.totalorder (%p840_p0), %v1415_v15, 1  ;;  %v891_v14 = vsel (%p840_p0), %vm888_vm2, %v1925_v63, 0.0  ;;  %vm900_vm5 = vcmp.eq.s32.totalorder (%p840_p0), %v1415_v15, 2  ;;  %v892_v11 = vsel (%p840_p0), %vm888_vm2, %v1931_v40, 0.0 }
 0x36f   : > { %vm852_vm7 = vcmp.gt.f32.partialorder %v1918_v50, %v850_v41  ;;  %vm853_vm13 = vcmp.gt.f32.partialorder %v829_v10, %v851_v59  ;;  %v896_v61 = vsel (%p840_p0), %vm893_vm4, %v662_v54, 0.0  ;;  %v903_v47 = vsel (%p840_p0), %vm900_vm5, %v1937_v19, 0.0 }
 0x370   : > { %v854_v43 = vsel %vm852_vm7, 1.0, %v1192_v17  ;;  %v855_v31 = vsel %vm853_vm13, 1.0, %v1192_v17  ;;  %v898_v35 = vadd.f32 (%p840_p0), %v896_v61, %v891_v14  ;;  %v897_v62 = vsel (%p840_p0), %vm893_vm4, %v1941_v7, 0.0 }
 0x371   : > { %856 = vadd.xlane.f32.xlu0 %v854_v43  ;;  %vm907_vm6 = vcmp.eq.s32.totalorder (%p840_p0), %v1415_v15, 3  ;;  %v899_v6 = vadd.f32 (%p840_p0), %v897_v62, %v892_v11  ;;  %v904_v28 = vsel (%p840_p0), %vm900_vm5, %v1939_v2, 0.0 }
 0x372   :  { %v905_v51 = vadd.f32 (%p840_p0), %v903_v47, %v898_v35 }
 0x373   :  { %v906_v60 = vadd.f32 (%p840_p0), %v904_v28, %v899_v6 }
 0x375   : > { %858 = vadd.xlane.f32.xlu0 %v855_v31 }
 0x3fe   : > { %v857_v36 = vpop.xlane.xlu0 %856 }
 0x3ff   : > { %vm860_vm14 = vcmp.ge.f32.partialorder %v857_v36, %v832_v0  ;;  %842 = sbr.rel (!%p840_p0) target bundleno = 875 (0x36b), region = 62 }
 0x400   : > { %v862_v23 = vsel %vm860_vm14, %v850_v41, %v1182_v23   ;;  %v864_v48 = vsel %vm860_vm14, %v1174_v26, %v850_v41  }
 0x401   : > { %v1173_v26 = vmov %v864_v48   ;;  %vm866_vm0 = vcmp.gt.f32.partialorder (%p840_p0), %v1918_v50, %v864_v48 }
 0x402   : > { %v859_v22 = vpop.xlane.xlu0 %858  ;;  %v868_v13 = vsel (%p840_p0), %vm866_vm0, 1.0, %v2050_v45  ;;  %v874_v44 = vsel (%p840_p0), %vm866_vm0, %v1918_v50, 0.0 }
 0x403   : > { %vm861_vm15 = vcmp.ge.f32.partialorder %v859_v22, %v833_v5  ;;  %870 = vadd.xlane.f32.xlu0 (%p840_p0), %v868_v13  ;;  %876 = vadd.xlane.f32.xlu1 (%p840_p0), %v874_v44 }
 0x404   : > { %v863_v33 = vsel %vm861_vm15, %v851_v59, %v1178_v33   ;;  %v865_v25 = vsel %vm861_vm15, %v1170_v16, %v851_v59  }
 0x405   : > { %v1169_v16 = vmov %v865_v25   ;;  %vm867_vm1 = vcmp.gt.f32.partialorder (%p840_p0), %v829_v10, %v865_v25 }
 0x406   :  { %v869_v34 = vsel %vm867_vm1, 1.0, %v2050_v45  ;;  %v875_v24 = vsel %vm867_vm1, %v829_v10, 0.0 }
 0x407   :  { %872 = vadd.xlane.f32.xlu0 %v869_v34  ;;  %878 = vadd.xlane.f32.xlu1 %v875_v24 }
 0x490   :  { %v871_v4 = vpop.xlane.xlu0 %870  ;;  %v877_v21 = vpop.xlane.xlu1 %876 }
 0x491   :  { %v880_v42 = vsub.f32 %v832_v0, %v871_v4 }
 0x493   :  { %v882_v37 = vmax.f32 %v880_v42, 0.0 }
 0x494   :  { %v873_v9 = vpop.xlane.xlu0 %872  ;;  %v879_v3 = vpop.xlane.xlu1 %878 }
 0x495   :  { %v884_v8 = vmul.f32 %v882_v37, %v864_v48  ;;  %v881_v52 = vsub.f32 %v833_v5, %v873_v9 }
 0x497   :  { %v883_v18 = vmax.f32 %v881_v52, 0.0  ;;  %v886_v30 = vadd.f32 %v884_v8, %v877_v21 }
 0x499   :  { %v885_v57 = vmul.f32 %v883_v18, %v865_v25  ;;  %v910_v27 = vsel %vm907_vm6, %v886_v30, 0.0 }
 0x49a   :  { %v912_v50 = vadd.f32 %v910_v27, %v905_v51 }
 0x49b   :  { %v887_v56 = vadd.f32 %v885_v57, %v879_v3 }
 0x49c   :  { %914 = vst [vmem:[%s1984_s4] sm:$0xff] %v912_v50 }
 0x49d   :  { %v911_v32 = vsel %vm907_vm6, %v887_v56, 0.0 }
 0x49e   :  { %v913_v46 = vadd.f32 %v911_v32, %v906_v60 }
 0x4a0   :  { %915 = vst [vmem:[%s1984_s4 + $0x8] sm:$0xff] %v913_v46 }

</bundles_post_ra>
